<compile_context>
chip_gen: v5e
topology: v5e:2x2
jax: 0.10.0
libtpu: 0.0.40
codegen_flags: <defaults>
</compile_context>

<pallas_src>
import jax
import jax.numpy as jnp
from jax.experimental import pallas as pl
from jax.experimental.pallas import tpu as pltpu

# ---- synthetic mini-BERT config (small shapes) ----
VOCAB = 100
HIDDEN = 32
HEADS = 4
HEAD_DIM = HIDDEN // HEADS
FFN = 64
LAYERS = 2
SEQ = 8
BATCH = 2
LN_EPS = 1e-12

BS = BATCH * SEQ            # batch folded into the row dim: 16
G = HEADS * BS              # head-and-batch-stacked attention rows: 64

# packed bf16 matrix-weight slab layout (rows; 128-lane aligned columns)
R_WQKV = 0                  # rows [0, 32)    : w_qkv (H, 3H)
R_WO = R_WQKV + HIDDEN      # rows [32, 64)   : w_o   (H, H)
R_W1 = R_WO + HIDDEN        # rows [64, 96)   : w1    (H, FFN)
R_W2 = R_W1 + HIDDEN        # rows [96, 160)  : w2    (FFN, H)
W_ROWS = R_W2 + FFN         # 160
PACK_COLS = 128             # dense, unmasked 128-lane DMA

# f32 vector slab rows (biases + LN params)
V_BQKV, V_BO, V_B1, V_B2, V_LN1G, V_LN1B, V_LN2G, V_LN2B = range(8)
VEC_ROWS = 8


def _gelu(x):
    # tanh approximation (EUP-friendly; same fn used in kernel and reference)
    c = jnp.float32(0.7978845608028654)  # sqrt(2/pi)
    return 0.5 * x * (1.0 + jnp.tanh(c * (x + 0.044715 * x * x * x)))


def _layer_norm(x, g, b):
    mu = jnp.mean(x, axis=-1, keepdims=True)
    var = jnp.mean((x - mu) ** 2, axis=-1, keepdims=True)
    return (x - mu) * jax.lax.rsqrt(var + LN_EPS) * g + b


def _mm(a, b):
    # MXU matmul: bf16 operands, f32 accumulation (portable across v5e/v6e/v7x).
    return jnp.dot(a.astype(jnp.bfloat16), b.astype(jnp.bfloat16),
                   preferred_element_type=jnp.float32)


# ---------------- fused Pallas kernel ----------------

def sbert_fused_kernel(x_ref, w_ref, vec_ref, bias_ref, pool_ref, o_ref):
    """Fused mini-BERT encoder (LAYERS x [attention + FFN]) + SBert mean pooling.

    x_ref    : (BS, H)  f32      embedded + LayerNormed tokens, batch folded into rows
    w_ref    : (LAYERS, W_ROWS, 128)  bf16   packed matrix weights (128-lane aligned)
    vec_ref  : (LAYERS, 8, 128)  f32         biases + LayerNorm params
    bias_ref : (G, G)   f32      additive attention bias: block-diagonal over (head,batch)
                                 plus key-padding mask, precomputed in the wrapper
    pool_ref : (BATCH, BS) f32   mask-normalized pooling matrix (mean pooling as a matmul)
    o_ref    : (BATCH, H) f32    pooled sentence embeddings
    """
    x = x_ref[...]                                   # (BS, H) f32, stays resident in VMEM
    bias = bias_ref[...]                             # (G, G) f32
    scale = jnp.float32(1.0 / (HEAD_DIM ** 0.5))

    for l in range(LAYERS):                          # static unroll, LAYERS=2
        # slice the REF per-matrix (no whole-layer slab materialized into vregs)
        w_qkv = w_ref[l, R_WQKV:R_WQKV + HIDDEN, :3 * HIDDEN]   # (H, 3H) bf16
        w_o = w_ref[l, R_WO:R_WO + HIDDEN, :HIDDEN]             # (H, H)  bf16
        w1 = w_ref[l, R_W1:R_W1 + HIDDEN, :FFN]                 # (H, FFN) bf16
        w2 = w_ref[l, R_W2:R_W2 + FFN, :HIDDEN]                 # (FFN, H) bf16
        b_qkv = vec_ref[l, V_BQKV:V_BQKV + 1, :3 * HIDDEN]      # (1, 3H) f32
        b_o = vec_ref[l, V_BO:V_BO + 1, :HIDDEN]
        b1 = vec_ref[l, V_B1:V_B1 + 1, :FFN]
        b2 = vec_ref[l, V_B2:V_B2 + 1, :HIDDEN]
        ln1_g = vec_ref[l, V_LN1G:V_LN1G + 1, :HIDDEN]
        ln1_b = vec_ref[l, V_LN1B:V_LN1B + 1, :HIDDEN]
        ln2_g = vec_ref[l, V_LN2G:V_LN2G + 1, :HIDDEN]
        ln2_b = vec_ref[l, V_LN2B:V_LN2B + 1, :HIDDEN]

        # ---- self-attention: one QKV matmul for the whole (B*S, H) slab ----
        qkv = _mm(x, w_qkv) + b_qkv                              # (BS, 3H) f32

        # Head-stack q/k/v along rows -> row order (head, batch, seq); 3 concats total.
        qs = jnp.concatenate(
            [qkv[:, h * HEAD_DIM:(h + 1) * HEAD_DIM] for h in range(HEADS)], axis=0)            # (G, HD)
        ks = jnp.concatenate(
            [qkv[:, HIDDEN + h * HEAD_DIM:HIDDEN + (h + 1) * HEAD_DIM] for h in range(HEADS)],
            axis=0)                                                                              # (G, HD)
        vs = jnp.concatenate(
            [qkv[:, 2 * HIDDEN + h * HEAD_DIM:2 * HIDDEN + (h + 1) * HEAD_DIM]
             for h in range(HEADS)], axis=0)                                                     # (G, HD)

        # One block-diagonal score matmul for all heads AND all batches (rhs-transposed
        # dot_general: contract last dims, no explicit k transpose).  bias carries -1e9 on
        # cross-(head,batch) blocks and on padded keys -> exp underflows to exactly 0 in f32.
        s = jax.lax.dot_general(
            qs.astype(jnp.bfloat16), ks.astype(jnp.bfloat16),
            dimension_numbers=(((1,), (1,)), ((), ())),
            preferred_element_type=jnp.float32) * scale + bias                                   # (G, G)
        s = s - jnp.max(s, axis=-1, keepdims=True)
        p = jnp.exp(s)
        p = p * pl.reciprocal(jnp.sum(p, axis=-1, keepdims=True), approx=True)

        ctx = _mm(p, vs)                                         # (G, HD) — one ctx matmul
        # back to (BS, H) with columns ordered (head, head_dim); 1 lane-concat
        ctx_bs = jnp.concatenate(
            [ctx[h * BS:(h + 1) * BS, :] for h in range(HEADS)], axis=1)                         # (BS, H)
        attn_out = _mm(ctx_bs, w_o) + b_o                        # single out-projection matmul
        x = _layer_norm(x + attn_out, ln1_g, ln1_b)

        # ---- FFN block on the whole slab ----
        h1 = _gelu(_mm(x, w1) + b1)
        y = _mm(h1, w2) + b2
        x = _layer_norm(x + y, ln2_g, ln2_b)

    # ---- SBert.mean_pooling fused as epilogue: ONE matmul vs mask-normalized pooling matrix ----
    o_ref[...] = _mm(pool_ref[...], x)                           # (BATCH, H)


# ---------------- Pallas wrapper ----------------

def sbert_encoder_pool(x_flat, w_slab, vec_slab, attn_bias, pool_mat):
    return pl.pallas_call(
        sbert_fused_kernel,
        out_shape=jax.ShapeDtypeStruct((BATCH, HIDDEN), jnp.float32),
        grid=(1,),
        in_specs=[
            pl.BlockSpec((BS, HIDDEN), lambda i: (0, 0)),
            pl.BlockSpec((LAYERS, W_ROWS, PACK_COLS), lambda i: (0, 0, 0)),
            pl.BlockSpec((LAYERS, VEC_ROWS, PACK_COLS), lambda i: (0, 0, 0)),
            pl.BlockSpec((G, G), lambda i: (0, 0)),
            pl.BlockSpec((BATCH, BS), lambda i: (0, 0)),
        ],
        out_specs=pl.BlockSpec((BATCH, HIDDEN), lambda i: (0, 0)),
        compiler_params=pltpu.CompilerParams(dimension_semantics=("arbitrary",)),
    )(x_flat, w_slab, vec_slab, attn_bias, pool_mat)


# ---------------- parameter init (deterministic, synthetic) ----------------

def _pack_layer_w(lp):
    w = jnp.zeros((W_ROWS, PACK_COLS), jnp.float32)
    w = w.at[R_WQKV:R_WQKV + HIDDEN, :3 * HIDDEN].set(lp['w_qkv'])
    w = w.at[R_WO:R_WO + HIDDEN, :HIDDEN].set(lp['w_o'])
    w = w.at[R_W1:R_W1 + HIDDEN, :FFN].set(lp['w1'])
    w = w.at[R_W2:R_W2 + FFN, :HIDDEN].set(lp['w2'])
    return w


def _pack_layer_vec(lp):
    v = jnp.zeros((VEC_ROWS, PACK_COLS), jnp.float32)
    v = v.at[V_BQKV, :3 * HIDDEN].set(lp['b_qkv'][0])
    v = v.at[V_BO, :HIDDEN].set(lp['b_o'][0])
    v = v.at[V_B1, :FFN].set(lp['b1'][0])
    v = v.at[V_B2, :HIDDEN].set(lp['b2'][0])
    v = v.at[V_LN1G, :HIDDEN].set(lp['ln1_g'][0])
    v = v.at[V_LN1B, :HIDDEN].set(lp['ln1_b'][0])
    v = v.at[V_LN2G, :HIDDEN].set(lp['ln2_g'][0])
    v = v.at[V_LN2B, :HIDDEN].set(lp['ln2_b'][0])
    return v


def init_params(key):
    keys = jax.random.split(key, 2 + LAYERS)

    def nrm(k, shape):
        return (0.02 * jax.random.normal(k, shape)).astype(jnp.float32)

    params = {
        'word_emb': nrm(keys[0], (VOCAB, HIDDEN)),
        'pos_emb': nrm(keys[1], (SEQ, HIDDEN)),
        'emb_ln_g': jnp.ones((HIDDEN,), jnp.float32),
        'emb_ln_b': jnp.zeros((HIDDEN,), jnp.float32),
        'layers': [],
    }
    for l in range(LAYERS):
        lk = jax.random.split(keys[2 + l], 4)
        params['layers'].append({
            'w_qkv': nrm(lk[0], (HIDDEN, 3 * HIDDEN)),
            'b_qkv': jnp.zeros((1, 3 * HIDDEN), jnp.float32),
            'w_o': nrm(lk[1], (HIDDEN, HIDDEN)),
            'b_o': jnp.zeros((1, HIDDEN), jnp.float32),
            'ln1_g': jnp.ones((1, HIDDEN), jnp.float32),
            'ln1_b': jnp.zeros((1, HIDDEN), jnp.float32),
            'w1': nrm(lk[2], (HIDDEN, FFN)),
            'b1': jnp.zeros((1, FFN), jnp.float32),
            'w2': nrm(lk[3], (FFN, HIDDEN)),
            'b2': jnp.zeros((1, HIDDEN), jnp.float32),
            'ln2_g': jnp.ones((1, HIDDEN), jnp.float32),
            'ln2_b': jnp.zeros((1, HIDDEN), jnp.float32),
        })
    # bf16 matrix-weight slab (halves the largest DMA; no per-matmul casts in the kernel);
    # biases / LN params kept f32 to preserve numerics.
    params['w_slab'] = jnp.stack(
        [_pack_layer_w(lp) for lp in params['layers']], axis=0).astype(jnp.bfloat16)
    params['vec_slab'] = jnp.stack(
        [_pack_layer_vec(lp) for lp in params['layers']], axis=0)
    return params


# ---------------- forward pass ----------------

def sbert_forward(ids, attention_mask, params):
    # embeddings (plain-JAX glue): table gather + learned positions + LayerNorm
    # TODO(synk): pretrained HF AutoModel weights are replaced by a deterministic synthetic mini-BERT.
    x = params['word_emb'][ids] + params['pos_emb'][None, :, :]
    x = _layer_norm(x, params['emb_ln_g'], params['emb_ln_b'])
    B, S, H = x.shape
    x_flat = x.reshape(B * S, H).astype(jnp.float32)        # rows ordered (batch, seq)

    mask_f = attention_mask.astype(jnp.float32)              # (B, S)

    # Additive attention bias for the (head, batch, seq)-stacked (G, G) score matrix:
    # cross-(head,batch) blocks and padded keys get -1e9 so exp underflows to exactly 0 (f32).
    group = jnp.arange(G, dtype=jnp.int32) // SEQ             # unique id per (head, batch) block
    blockdiag = jnp.where(group[:, None] == group[None, :],
                          jnp.float32(0.0), jnp.float32(-1e9))          # (G, G)
    key_neg = jnp.tile((1.0 - mask_f).reshape(-1) * jnp.float32(-1e9), (HEADS,))   # (G,)
    attn_bias = blockdiag + key_neg[None, :]                  # (G, G) f32

    # Mask-normalized pooling matrix: pooled = P @ x_tokens  (mean pooling as one matmul).
    counts = jnp.maximum(jnp.sum(mask_f, axis=1, keepdims=True), 1e-9)  # (B, 1)
    pool_rows = mask_f / counts                                         # (B, S)
    pool_mat = (jnp.eye(BATCH, dtype=jnp.float32)[:, :, None]
                * pool_rows[None, :, :]).reshape(BATCH, B * S)          # (B, B*S)

    return sbert_encoder_pool(x_flat, params['w_slab'], params['vec_slab'],
                              attn_bias, pool_mat)


# ---------------- pure-JAX reference (for verification) ----------------

def ref_forward(ids, attention_mask, params):
    hp = jax.lax.Precision.HIGHEST
    x = params['word_emb'][ids] + params['pos_emb'][None, :, :]
    x = _layer_norm(x, params['emb_ln_g'], params['emb_ln_b'])
    mask_f = attention_mask.astype(jnp.float32)
    neg = (1.0 - mask_f)[:, None, None, :] * -1e9      # (B, 1, 1, S)
    B, S = mask_f.shape
    for p in params['layers']:
        qkv = jnp.einsum('bsh,hd->bsd', x, p['w_qkv'], precision=hp) + p['b_qkv'][0]
        q, k, v = jnp.split(qkv, 3, axis=-1)

        def heads(t):
            return t.reshape(B, S, HEADS, HEAD_DIM).transpose(0, 2, 1, 3)

        qh, kh, vh = heads(q), heads(k), heads(v)
        s = jnp.einsum('bnqd,bnkd->bnqk', qh, kh, precision=hp) / (HEAD_DIM ** 0.5) + neg
        pm = jax.nn.softmax(s, axis=-1)
        ctx = jnp.einsum('bnqk,bnkd->bnqd', pm, vh, precision=hp)
        ctx = ctx.transpose(0, 2, 1, 3).reshape(B, S, HIDDEN)
        attn_out = jnp.einsum('bsh,hd->bsd', ctx, p['w_o'], precision=hp) + p['b_o'][0]
        x = _layer_norm(x + attn_out, p['ln1_g'], p['ln1_b'])
        h = _gelu(jnp.einsum('bsh,hf->bsf', x, p['w1'], precision=hp) + p['b1'][0])
        y = jnp.einsum('bsf,fh->bsh', h, p['w2'], precision=hp) + p['b2'][0]
        x = _layer_norm(x + y, p['ln2_g'], p['ln2_b'])
    me = mask_f[:, :, None]
    return jnp.sum(x * me, axis=1) / jnp.maximum(jnp.sum(me, axis=1), 1e-9)


if __name__ == "__main__":
    key = jax.random.PRNGKey(0)
    pkey, ikey = jax.random.split(key)
    params = init_params(pkey)

    ids = jax.random.randint(ikey, (BATCH, SEQ), 0, VOCAB, dtype=jnp.int32)
    attention_mask = jnp.array([[1, 1, 1, 1, 1, 1, 1, 1],
                                [1, 1, 1, 1, 1, 0, 0, 0]], dtype=jnp.int32)

    out = sbert_forward(ids, attention_mask, params)
    out = jax.block_until_ready(out)
    assert out.shape == (BATCH, HIDDEN)

    ref = ref_forward(ids, attention_mask, params)
    # bf16 MXU operands + approx reciprocal vs HIGHEST-precision f32 reference
    if not jnp.allclose(out, ref, atol=3e-2, rtol=3e-2):
        raise AssertionError("Pallas output mismatch vs pure-JAX reference")

    print("KERNEL_OK")
</pallas_src>

<mosaic_0001>
module attributes {stable_mosaic.version = 11 : i64} {
  func.func @sbert_fused_kernel(%arg0: i32, %arg1: memref<16x32xf32, #tpu.memory_space<vmem>>, %arg2: memref<2x160x128xbf16, #tpu.memory_space<vmem>>, %arg3: memref<2x8x128xf32, #tpu.memory_space<vmem>>, %arg4: memref<64x64xf32, #tpu.memory_space<vmem>>, %arg5: memref<2x16xf32, #tpu.memory_space<vmem>>, %arg6: memref<2x32xf32, #tpu.memory_space<vmem>>) attributes {dimension_semantics = [#tpu.dimension_semantics<arbitrary>], iteration_bounds = array<i64: 1>, scalar_prefetch = 0 : i64, scratch_operands = 0 : i64, tpu.core_type = #tpu.core_type<tc>, window_params = [{pipeline_mode = #tpu.pipeline_mode<synchronous>, transform_indices = @transform_0, window_bounds = array<i64: 16, 32>}, {pipeline_mode = #tpu.pipeline_mode<synchronous>, transform_indices = @transform_1, window_bounds = array<i64: 2, 160, 128>}, {pipeline_mode = #tpu.pipeline_mode<synchronous>, transform_indices = @transform_2, window_bounds = array<i64: 2, 8, 128>}, {pipeline_mode = #tpu.pipeline_mode<synchronous>, transform_indices = @transform_3, window_bounds = array<i64: 64, 64>}, {pipeline_mode = #tpu.pipeline_mode<synchronous>, transform_indices = @transform_4, window_bounds = array<i64: 2, 16>}, {pipeline_mode = #tpu.pipeline_mode<synchronous>, transform_indices = @transform_5, window_bounds = array<i64: 2, 32>}]} {
    %c0 = arith.constant 0 : index
    %c0_0 = arith.constant 0 : index
    %0 = vector.load %arg1[%c0, %c0_0] : memref<16x32xf32, #tpu.memory_space<vmem>>, vector<16x32xf32>
    %c0_1 = arith.constant 0 : index
    %c0_2 = arith.constant 0 : index
    %1 = vector.load %arg4[%c0_1, %c0_2] : memref<64x64xf32, #tpu.memory_space<vmem>>, vector<64x64xf32>
    %c0_3 = arith.constant 0 : index
    %c0_4 = arith.constant 0 : index
    %c0_5 = arith.constant 0 : index
    %2 = vector.load %arg2[%c0_3, %c0_4, %c0_5] : memref<2x160x128xbf16, #tpu.memory_space<vmem>>, vector<1x32x96xbf16>
    %3 = vector.shape_cast %2 : vector<1x32x96xbf16> to vector<32x96xbf16>
    %c0_6 = arith.constant 0 : index
    %c32 = arith.constant 32 : index
    %c0_7 = arith.constant 0 : index
    %4 = vector.load %arg2[%c0_6, %c32, %c0_7] : memref<2x160x128xbf16, #tpu.memory_space<vmem>>, vector<1x32x32xbf16>
    %5 = vector.shape_cast %4 : vector<1x32x32xbf16> to vector<32x32xbf16>
    %c0_8 = arith.constant 0 : index
    %c64 = arith.constant 64 : index
    %c0_9 = arith.constant 0 : index
    %6 = vector.load %arg2[%c0_8, %c64, %c0_9] : memref<2x160x128xbf16, #tpu.memory_space<vmem>>, vector<1x32x64xbf16>
    %7 = vector.shape_cast %6 : vector<1x32x64xbf16> to vector<32x64xbf16>
    %c0_10 = arith.constant 0 : index
    %c96 = arith.constant 96 : index
    %c0_11 = arith.constant 0 : index
    %8 = vector.load %arg2[%c0_10, %c96, %c0_11] : memref<2x160x128xbf16, #tpu.memory_space<vmem>>, vector<1x64x32xbf16>
    %9 = vector.shape_cast %8 : vector<1x64x32xbf16> to vector<64x32xbf16>
    %c0_12 = arith.constant 0 : index
    %c0_13 = arith.constant 0 : index
    %c0_14 = arith.constant 0 : index
    %10 = vector.load %arg3[%c0_12, %c0_13, %c0_14] : memref<2x8x128xf32, #tpu.memory_space<vmem>>, vector<1x1x96xf32>
    %11 = vector.shape_cast %10 : vector<1x1x96xf32> to vector<1x96xf32>
    %c0_15 = arith.constant 0 : index
    %c1 = arith.constant 1 : index
    %c0_16 = arith.constant 0 : index
    %12 = vector.load %arg3[%c0_15, %c1, %c0_16] : memref<2x8x128xf32, #tpu.memory_space<vmem>>, vector<1x1x32xf32>
    %13 = vector.shape_cast %12 : vector<1x1x32xf32> to vector<1x32xf32>
    %c0_17 = arith.constant 0 : index
    %c2 = arith.constant 2 : index
    %c0_18 = arith.constant 0 : index
    %14 = vector.load %arg3[%c0_17, %c2, %c0_18] : memref<2x8x128xf32, #tpu.memory_space<vmem>>, vector<1x1x64xf32>
    %15 = vector.shape_cast %14 : vector<1x1x64xf32> to vector<1x64xf32>
    %c0_19 = arith.constant 0 : index
    %c3 = arith.constant 3 : index
    %c0_20 = arith.constant 0 : index
    %16 = vector.load %arg3[%c0_19, %c3, %c0_20] : memref<2x8x128xf32, #tpu.memory_space<vmem>>, vector<1x1x32xf32>
    %17 = vector.shape_cast %16 : vector<1x1x32xf32> to vector<1x32xf32>
    %c0_21 = arith.constant 0 : index
    %c4 = arith.constant 4 : index
    %c0_22 = arith.constant 0 : index
    %18 = vector.load %arg3[%c0_21, %c4, %c0_22] : memref<2x8x128xf32, #tpu.memory_space<vmem>>, vector<1x1x32xf32>
    %19 = vector.shape_cast %18 : vector<1x1x32xf32> to vector<1x32xf32>
    %c0_23 = arith.constant 0 : index
    %c5 = arith.constant 5 : index
    %c0_24 = arith.constant 0 : index
    %20 = vector.load %arg3[%c0_23, %c5, %c0_24] : memref<2x8x128xf32, #tpu.memory_space<vmem>>, vector<1x1x32xf32>
    %21 = vector.shape_cast %20 : vector<1x1x32xf32> to vector<1x32xf32>
    %c0_25 = arith.constant 0 : index
    %c6 = arith.constant 6 : index
    %c0_26 = arith.constant 0 : index
    %22 = vector.load %arg3[%c0_25, %c6, %c0_26] : memref<2x8x128xf32, #tpu.memory_space<vmem>>, vector<1x1x32xf32>
    %23 = vector.shape_cast %22 : vector<1x1x32xf32> to vector<1x32xf32>
    %c0_27 = arith.constant 0 : index
    %c7 = arith.constant 7 : index
    %c0_28 = arith.constant 0 : index
    %24 = vector.load %arg3[%c0_27, %c7, %c0_28] : memref<2x8x128xf32, #tpu.memory_space<vmem>>, vector<1x1x32xf32>
    %25 = vector.shape_cast %24 : vector<1x1x32xf32> to vector<1x32xf32>
    %26 = arith.truncf %0 : vector<16x32xf32> to vector<16x32xbf16>
    %cst = arith.constant dense<0.000000e+00> : vector<16x96xf32>
    %27 = tpu.matmul %26, %3, %cst {dimension_numbers = #tpu.dot_dimension_numbers<[1], [0], [0], [1], [0, 0, 1, 1], [], []>} : vector<16x32xbf16>, vector<32x96xbf16>, vector<16x96xf32> -> vector<16x96xf32>
    %28 = vector.broadcast %11 : vector<1x96xf32> to vector<16x96xf32>
    %29 = arith.addf %27, %28 : vector<16x96xf32>
    %30 = vector.extract_strided_slice %29 {offsets = [0, 0], sizes = [16, 8], strides = [1, 1]} : vector<16x96xf32> to vector<16x8xf32>
    %31 = vector.extract_strided_slice %29 {offsets = [0, 8], sizes = [16, 8], strides = [1, 1]} : vector<16x96xf32> to vector<16x8xf32>
    %32 = vector.extract_strided_slice %29 {offsets = [0, 16], sizes = [16, 8], strides = [1, 1]} : vector<16x96xf32> to vector<16x8xf32>
    %33 = vector.extract_strided_slice %29 {offsets = [0, 24], sizes = [16, 8], strides = [1, 1]} : vector<16x96xf32> to vector<16x8xf32>
    %34 = tpu.concatenate %30, %31, %32, %33 in 0 : vector<16x8xf32>, vector<16x8xf32>, vector<16x8xf32>, vector<16x8xf32> -> vector<64x8xf32>
    %35 = vector.extract_strided_slice %29 {offsets = [0, 32], sizes = [16, 8], strides = [1, 1]} : vector<16x96xf32> to vector<16x8xf32>
    %36 = vector.extract_strided_slice %29 {offsets = [0, 40], sizes = [16, 8], strides = [1, 1]} : vector<16x96xf32> to vector<16x8xf32>
    %37 = vector.extract_strided_slice %29 {offsets = [0, 48], sizes = [16, 8], strides = [1, 1]} : vector<16x96xf32> to vector<16x8xf32>
    %38 = vector.extract_strided_slice %29 {offsets = [0, 56], sizes = [16, 8], strides = [1, 1]} : vector<16x96xf32> to vector<16x8xf32>
    %39 = tpu.concatenate %35, %36, %37, %38 in 0 : vector<16x8xf32>, vector<16x8xf32>, vector<16x8xf32>, vector<16x8xf32> -> vector<64x8xf32>
    %40 = vector.extract_strided_slice %29 {offsets = [0, 64], sizes = [16, 8], strides = [1, 1]} : vector<16x96xf32> to vector<16x8xf32>
    %41 = vector.extract_strided_slice %29 {offsets = [0, 72], sizes = [16, 8], strides = [1, 1]} : vector<16x96xf32> to vector<16x8xf32>
    %42 = vector.extract_strided_slice %29 {offsets = [0, 80], sizes = [16, 8], strides = [1, 1]} : vector<16x96xf32> to vector<16x8xf32>
    %43 = vector.extract_strided_slice %29 {offsets = [0, 88], sizes = [16, 8], strides = [1, 1]} : vector<16x96xf32> to vector<16x8xf32>
    %44 = tpu.concatenate %40, %41, %42, %43 in 0 : vector<16x8xf32>, vector<16x8xf32>, vector<16x8xf32>, vector<16x8xf32> -> vector<64x8xf32>
    %45 = arith.truncf %34 : vector<64x8xf32> to vector<64x8xbf16>
    %46 = arith.truncf %39 : vector<64x8xf32> to vector<64x8xbf16>
    %cst_29 = arith.constant dense<0.000000e+00> : vector<64x64xf32>
    %47 = tpu.matmul %45, %46, %cst_29 {dimension_numbers = #tpu.dot_dimension_numbers<[1], [1], [0], [0], [0, 0, 1, 0], [], []>} : vector<64x8xbf16>, vector<64x8xbf16>, vector<64x64xf32> -> vector<64x64xf32>
    %cst_30 = arith.constant 0.353553385 : f32
    %48 = vector.broadcast %cst_30 : f32 to vector<64x64xf32>
    %49 = arith.mulf %47, %48 : vector<64x64xf32>
    %50 = arith.addf %49, %1 : vector<64x64xf32>
    %cst_31 = arith.constant dense<0xFF800000> : vector<64xf32>
    %51 = vector.multi_reduction <maximumf>, %50, %cst_31 [1] : vector<64x64xf32> to vector<64xf32>
    %52 = vector.shape_cast %51 : vector<64xf32> to vector<64x1xf32>
    %53 = vector.broadcast %52 : vector<64x1xf32> to vector<64x64xf32>
    %54 = arith.subf %50, %53 : vector<64x64xf32>
    %55 = math.exp %54 : vector<64x64xf32>
    %cst_32 = arith.constant dense<0.000000e+00> : vector<64xf32>
    %56 = vector.multi_reduction <add>, %55, %cst_32 [1] : vector<64x64xf32> to vector<64xf32>
    %57 = vector.shape_cast %56 : vector<64xf32> to vector<64x1xf32>
    %58 = tpu.reciprocal %57 {approx = true} : vector<64x1xf32> -> vector<64x1xf32>
    %59 = vector.broadcast %58 : vector<64x1xf32> to vector<64x64xf32>
    %60 = arith.mulf %55, %59 : vector<64x64xf32>
    %61 = arith.truncf %60 : vector<64x64xf32> to vector<64x64xbf16>
    %62 = arith.truncf %44 : vector<64x8xf32> to vector<64x8xbf16>
    %cst_33 = arith.constant dense<0.000000e+00> : vector<64x8xf32>
    %63 = tpu.matmul %61, %62, %cst_33 {dimension_numbers = #tpu.dot_dimension_numbers<[1], [0], [0], [1], [0, 0, 1, 1], [], []>} : vector<64x64xbf16>, vector<64x8xbf16>, vector<64x8xf32> -> vector<64x8xf32>
    %64 = vector.extract_strided_slice %63 {offsets = [0, 0], sizes = [16, 8], strides = [1, 1]} : vector<64x8xf32> to vector<16x8xf32>
    %65 = vector.extract_strided_slice %63 {offsets = [16, 0], sizes = [16, 8], strides = [1, 1]} : vector<64x8xf32> to vector<16x8xf32>
    %66 = vector.extract_strided_slice %63 {offsets = [32, 0], sizes = [16, 8], strides = [1, 1]} : vector<64x8xf32> to vector<16x8xf32>
    %67 = vector.extract_strided_slice %63 {offsets = [48, 0], sizes = [16, 8], strides = [1, 1]} : vector<64x8xf32> to vector<16x8xf32>
    %68 = tpu.concatenate %64, %65, %66, %67 in 1 : vector<16x8xf32>, vector<16x8xf32>, vector<16x8xf32>, vector<16x8xf32> -> vector<16x32xf32>
    %69 = arith.truncf %68 : vector<16x32xf32> to vector<16x32xbf16>
    %cst_34 = arith.constant dense<0.000000e+00> : vector<16x32xf32>
    %70 = tpu.matmul %69, %5, %cst_34 {dimension_numbers = #tpu.dot_dimension_numbers<[1], [0], [0], [1], [0, 0, 1, 1], [], []>} : vector<16x32xbf16>, vector<32x32xbf16>, vector<16x32xf32> -> vector<16x32xf32>
    %71 = vector.broadcast %13 : vector<1x32xf32> to vector<16x32xf32>
    %72 = arith.addf %70, %71 : vector<16x32xf32>
    %73 = arith.addf %0, %72 : vector<16x32xf32>
    %cst_35 = arith.constant dense<0.000000e+00> : vector<16xf32>
    %74 = vector.multi_reduction <add>, %73, %cst_35 [1] : vector<16x32xf32> to vector<16xf32>
    %75 = vector.shape_cast %74 : vector<16xf32> to vector<16x1xf32>
    %cst_36 = arith.constant 3.200000e+01 : f32
    %76 = vector.broadcast %cst_36 : f32 to vector<16x1xf32>
    %77 = arith.divf %75, %76 : vector<16x1xf32>
    %78 = vector.broadcast %77 : vector<16x1xf32> to vector<16x32xf32>
    %79 = arith.subf %73, %78 : vector<16x32xf32>
    %80 = arith.mulf %79, %79 : vector<16x32xf32>
    %cst_37 = arith.constant dense<0.000000e+00> : vector<16xf32>
    %81 = vector.multi_reduction <add>, %80, %cst_37 [1] : vector<16x32xf32> to vector<16xf32>
    %82 = vector.shape_cast %81 : vector<16xf32> to vector<16x1xf32>
    %cst_38 = arith.constant 3.200000e+01 : f32
    %83 = vector.broadcast %cst_38 : f32 to vector<16x1xf32>
    %84 = arith.divf %82, %83 : vector<16x1xf32>
    %85 = vector.broadcast %77 : vector<16x1xf32> to vector<16x32xf32>
    %86 = arith.subf %73, %85 : vector<16x32xf32>
    %cst_39 = arith.constant 9.99999996E-13 : f32
    %87 = vector.broadcast %cst_39 : f32 to vector<16x1xf32>
    %88 = arith.addf %84, %87 : vector<16x1xf32>
    %89 = math.rsqrt %88 : vector<16x1xf32>
    %90 = vector.broadcast %89 : vector<16x1xf32> to vector<16x32xf32>
    %91 = arith.mulf %86, %90 : vector<16x32xf32>
    %92 = vector.broadcast %19 : vector<1x32xf32> to vector<16x32xf32>
    %93 = arith.mulf %91, %92 : vector<16x32xf32>
    %94 = vector.broadcast %21 : vector<1x32xf32> to vector<16x32xf32>
    %95 = arith.addf %93, %94 : vector<16x32xf32>
    %96 = arith.truncf %95 : vector<16x32xf32> to vector<16x32xbf16>
    %cst_40 = arith.constant dense<0.000000e+00> : vector<16x64xf32>
    %97 = tpu.matmul %96, %7, %cst_40 {dimension_numbers = #tpu.dot_dimension_numbers<[1], [0], [0], [1], [0, 0, 1, 1], [], []>} : vector<16x32xbf16>, vector<32x64xbf16>, vector<16x64xf32> -> vector<16x64xf32>
    %98 = vector.broadcast %15 : vector<1x64xf32> to vector<16x64xf32>
    %99 = arith.addf %97, %98 : vector<16x64xf32>
    %cst_41 = arith.constant 5.000000e-01 : f32
    %100 = vector.broadcast %cst_41 : f32 to vector<16x64xf32>
    %101 = arith.mulf %100, %99 : vector<16x64xf32>
    %cst_42 = arith.constant 4.471500e-02 : f32
    %102 = vector.broadcast %cst_42 : f32 to vector<16x64xf32>
    %103 = arith.mulf %102, %99 : vector<16x64xf32>
    %104 = arith.mulf %103, %99 : vector<16x64xf32>
    %105 = arith.mulf %104, %99 : vector<16x64xf32>
    %106 = arith.addf %99, %105 : vector<16x64xf32>
    %cst_43 = arith.constant 0.797884583 : f32
    %107 = vector.broadcast %cst_43 : f32 to vector<16x64xf32>
    %108 = arith.mulf %107, %106 : vector<16x64xf32>
    %109 = math.tanh %108 : vector<16x64xf32>
    %cst_44 = arith.constant 1.000000e+00 : f32
    %110 = vector.broadcast %cst_44 : f32 to vector<16x64xf32>
    %111 = arith.addf %110, %109 : vector<16x64xf32>
    %112 = arith.mulf %101, %111 : vector<16x64xf32>
    %113 = arith.truncf %112 : vector<16x64xf32> to vector<16x64xbf16>
    %cst_45 = arith.constant dense<0.000000e+00> : vector<16x32xf32>
    %114 = tpu.matmul %113, %9, %cst_45 {dimension_numbers = #tpu.dot_dimension_numbers<[1], [0], [0], [1], [0, 0, 1, 1], [], []>} : vector<16x64xbf16>, vector<64x32xbf16>, vector<16x32xf32> -> vector<16x32xf32>
    %115 = vector.broadcast %17 : vector<1x32xf32> to vector<16x32xf32>
    %116 = arith.addf %114, %115 : vector<16x32xf32>
    %117 = arith.addf %95, %116 : vector<16x32xf32>
    %cst_46 = arith.constant dense<0.000000e+00> : vector<16xf32>
    %118 = vector.multi_reduction <add>, %117, %cst_46 [1] : vector<16x32xf32> to vector<16xf32>
    %119 = vector.shape_cast %118 : vector<16xf32> to vector<16x1xf32>
    %cst_47 = arith.constant 3.200000e+01 : f32
    %120 = vector.broadcast %cst_47 : f32 to vector<16x1xf32>
    %121 = arith.divf %119, %120 : vector<16x1xf32>
    %122 = vector.broadcast %121 : vector<16x1xf32> to vector<16x32xf32>
    %123 = arith.subf %117, %122 : vector<16x32xf32>
    %124 = arith.mulf %123, %123 : vector<16x32xf32>
    %cst_48 = arith.constant dense<0.000000e+00> : vector<16xf32>
    %125 = vector.multi_reduction <add>, %124, %cst_48 [1] : vector<16x32xf32> to vector<16xf32>
    %126 = vector.shape_cast %125 : vector<16xf32> to vector<16x1xf32>
    %cst_49 = arith.constant 3.200000e+01 : f32
    %127 = vector.broadcast %cst_49 : f32 to vector<16x1xf32>
    %128 = arith.divf %126, %127 : vector<16x1xf32>
    %129 = vector.broadcast %121 : vector<16x1xf32> to vector<16x32xf32>
    %130 = arith.subf %117, %129 : vector<16x32xf32>
    %cst_50 = arith.constant 9.99999996E-13 : f32
    %131 = vector.broadcast %cst_50 : f32 to vector<16x1xf32>
    %132 = arith.addf %128, %131 : vector<16x1xf32>
    %133 = math.rsqrt %132 : vector<16x1xf32>
    %134 = vector.broadcast %133 : vector<16x1xf32> to vector<16x32xf32>
    %135 = arith.mulf %130, %134 : vector<16x32xf32>
    %136 = vector.broadcast %23 : vector<1x32xf32> to vector<16x32xf32>
    %137 = arith.mulf %135, %136 : vector<16x32xf32>
    %138 = vector.broadcast %25 : vector<1x32xf32> to vector<16x32xf32>
    %139 = arith.addf %137, %138 : vector<16x32xf32>
    %c1_51 = arith.constant 1 : index
    %c0_52 = arith.constant 0 : index
    %c0_53 = arith.constant 0 : index
    %140 = vector.load %arg2[%c1_51, %c0_52, %c0_53] : memref<2x160x128xbf16, #tpu.memory_space<vmem>>, vector<1x32x96xbf16>
    %141 = vector.shape_cast %140 : vector<1x32x96xbf16> to vector<32x96xbf16>
    %c1_54 = arith.constant 1 : index
    %c32_55 = arith.constant 32 : index
    %c0_56 = arith.constant 0 : index
    %142 = vector.load %arg2[%c1_54, %c32_55, %c0_56] : memref<2x160x128xbf16, #tpu.memory_space<vmem>>, vector<1x32x32xbf16>
    %143 = vector.shape_cast %142 : vector<1x32x32xbf16> to vector<32x32xbf16>
    %c1_57 = arith.constant 1 : index
    %c64_58 = arith.constant 64 : index
    %c0_59 = arith.constant 0 : index
    %144 = vector.load %arg2[%c1_57, %c64_58, %c0_59] : memref<2x160x128xbf16, #tpu.memory_space<vmem>>, vector<1x32x64xbf16>
    %145 = vector.shape_cast %144 : vector<1x32x64xbf16> to vector<32x64xbf16>
    %c1_60 = arith.constant 1 : index
    %c96_61 = arith.constant 96 : index
    %c0_62 = arith.constant 0 : index
    %146 = vector.load %arg2[%c1_60, %c96_61, %c0_62] : memref<2x160x128xbf16, #tpu.memory_space<vmem>>, vector<1x64x32xbf16>
    %147 = vector.shape_cast %146 : vector<1x64x32xbf16> to vector<64x32xbf16>
    %c1_63 = arith.constant 1 : index
    %c0_64 = arith.constant 0 : index
    %c0_65 = arith.constant 0 : index
    %148 = vector.load %arg3[%c1_63, %c0_64, %c0_65] : memref<2x8x128xf32, #tpu.memory_space<vmem>>, vector<1x1x96xf32>
    %149 = vector.shape_cast %148 : vector<1x1x96xf32> to vector<1x96xf32>
    %c1_66 = arith.constant 1 : index
    %c1_67 = arith.constant 1 : index
    %c0_68 = arith.constant 0 : index
    %150 = vector.load %arg3[%c1_66, %c1_67, %c0_68] : memref<2x8x128xf32, #tpu.memory_space<vmem>>, vector<1x1x32xf32>
    %151 = vector.shape_cast %150 : vector<1x1x32xf32> to vector<1x32xf32>
    %c1_69 = arith.constant 1 : index
    %c2_70 = arith.constant 2 : index
    %c0_71 = arith.constant 0 : index
    %152 = vector.load %arg3[%c1_69, %c2_70, %c0_71] : memref<2x8x128xf32, #tpu.memory_space<vmem>>, vector<1x1x64xf32>
    %153 = vector.shape_cast %152 : vector<1x1x64xf32> to vector<1x64xf32>
    %c1_72 = arith.constant 1 : index
    %c3_73 = arith.constant 3 : index
    %c0_74 = arith.constant 0 : index
    %154 = vector.load %arg3[%c1_72, %c3_73, %c0_74] : memref<2x8x128xf32, #tpu.memory_space<vmem>>, vector<1x1x32xf32>
    %155 = vector.shape_cast %154 : vector<1x1x32xf32> to vector<1x32xf32>
    %c1_75 = arith.constant 1 : index
    %c4_76 = arith.constant 4 : index
    %c0_77 = arith.constant 0 : index
    %156 = vector.load %arg3[%c1_75, %c4_76, %c0_77] : memref<2x8x128xf32, #tpu.memory_space<vmem>>, vector<1x1x32xf32>
    %157 = vector.shape_cast %156 : vector<1x1x32xf32> to vector<1x32xf32>
    %c1_78 = arith.constant 1 : index
    %c5_79 = arith.constant 5 : index
    %c0_80 = arith.constant 0 : index
    %158 = vector.load %arg3[%c1_78, %c5_79, %c0_80] : memref<2x8x128xf32, #tpu.memory_space<vmem>>, vector<1x1x32xf32>
    %159 = vector.shape_cast %158 : vector<1x1x32xf32> to vector<1x32xf32>
    %c1_81 = arith.constant 1 : index
    %c6_82 = arith.constant 6 : index
    %c0_83 = arith.constant 0 : index
    %160 = vector.load %arg3[%c1_81, %c6_82, %c0_83] : memref<2x8x128xf32, #tpu.memory_space<vmem>>, vector<1x1x32xf32>
    %161 = vector.shape_cast %160 : vector<1x1x32xf32> to vector<1x32xf32>
    %c1_84 = arith.constant 1 : index
    %c7_85 = arith.constant 7 : index
    %c0_86 = arith.constant 0 : index
    %162 = vector.load %arg3[%c1_84, %c7_85, %c0_86] : memref<2x8x128xf32, #tpu.memory_space<vmem>>, vector<1x1x32xf32>
    %163 = vector.shape_cast %162 : vector<1x1x32xf32> to vector<1x32xf32>
    %164 = arith.truncf %139 : vector<16x32xf32> to vector<16x32xbf16>
    %cst_87 = arith.constant dense<0.000000e+00> : vector<16x96xf32>
    %165 = tpu.matmul %164, %141, %cst_87 {dimension_numbers = #tpu.dot_dimension_numbers<[1], [0], [0], [1], [0, 0, 1, 1], [], []>} : vector<16x32xbf16>, vector<32x96xbf16>, vector<16x96xf32> -> vector<16x96xf32>
    %166 = vector.broadcast %149 : vector<1x96xf32> to vector<16x96xf32>
    %167 = arith.addf %165, %166 : vector<16x96xf32>
    %168 = vector.extract_strided_slice %167 {offsets = [0, 0], sizes = [16, 8], strides = [1, 1]} : vector<16x96xf32> to vector<16x8xf32>
    %169 = vector.extract_strided_slice %167 {offsets = [0, 8], sizes = [16, 8], strides = [1, 1]} : vector<16x96xf32> to vector<16x8xf32>
    %170 = vector.extract_strided_slice %167 {offsets = [0, 16], sizes = [16, 8], strides = [1, 1]} : vector<16x96xf32> to vector<16x8xf32>
    %171 = vector.extract_strided_slice %167 {offsets = [0, 24], sizes = [16, 8], strides = [1, 1]} : vector<16x96xf32> to vector<16x8xf32>
    %172 = tpu.concatenate %168, %169, %170, %171 in 0 : vector<16x8xf32>, vector<16x8xf32>, vector<16x8xf32>, vector<16x8xf32> -> vector<64x8xf32>
    %173 = vector.extract_strided_slice %167 {offsets = [0, 32], sizes = [16, 8], strides = [1, 1]} : vector<16x96xf32> to vector<16x8xf32>
    %174 = vector.extract_strided_slice %167 {offsets = [0, 40], sizes = [16, 8], strides = [1, 1]} : vector<16x96xf32> to vector<16x8xf32>
    %175 = vector.extract_strided_slice %167 {offsets = [0, 48], sizes = [16, 8], strides = [1, 1]} : vector<16x96xf32> to vector<16x8xf32>
    %176 = vector.extract_strided_slice %167 {offsets = [0, 56], sizes = [16, 8], strides = [1, 1]} : vector<16x96xf32> to vector<16x8xf32>
    %177 = tpu.concatenate %173, %174, %175, %176 in 0 : vector<16x8xf32>, vector<16x8xf32>, vector<16x8xf32>, vector<16x8xf32> -> vector<64x8xf32>
    %178 = vector.extract_strided_slice %167 {offsets = [0, 64], sizes = [16, 8], strides = [1, 1]} : vector<16x96xf32> to vector<16x8xf32>
    %179 = vector.extract_strided_slice %167 {offsets = [0, 72], sizes = [16, 8], strides = [1, 1]} : vector<16x96xf32> to vector<16x8xf32>
    %180 = vector.extract_strided_slice %167 {offsets = [0, 80], sizes = [16, 8], strides = [1, 1]} : vector<16x96xf32> to vector<16x8xf32>
    %181 = vector.extract_strided_slice %167 {offsets = [0, 88], sizes = [16, 8], strides = [1, 1]} : vector<16x96xf32> to vector<16x8xf32>
    %182 = tpu.concatenate %178, %179, %180, %181 in 0 : vector<16x8xf32>, vector<16x8xf32>, vector<16x8xf32>, vector<16x8xf32> -> vector<64x8xf32>
    %183 = arith.truncf %172 : vector<64x8xf32> to vector<64x8xbf16>
    %184 = arith.truncf %177 : vector<64x8xf32> to vector<64x8xbf16>
    %cst_88 = arith.constant dense<0.000000e+00> : vector<64x64xf32>
    %185 = tpu.matmul %183, %184, %cst_88 {dimension_numbers = #tpu.dot_dimension_numbers<[1], [1], [0], [0], [0, 0, 1, 0], [], []>} : vector<64x8xbf16>, vector<64x8xbf16>, vector<64x64xf32> -> vector<64x64xf32>
    %cst_89 = arith.constant 0.353553385 : f32
    %186 = vector.broadcast %cst_89 : f32 to vector<64x64xf32>
    %187 = arith.mulf %185, %186 : vector<64x64xf32>
    %188 = arith.addf %187, %1 : vector<64x64xf32>
    %cst_90 = arith.constant dense<0xFF800000> : vector<64xf32>
    %189 = vector.multi_reduction <maximumf>, %188, %cst_90 [1] : vector<64x64xf32> to vector<64xf32>
    %190 = vector.shape_cast %189 : vector<64xf32> to vector<64x1xf32>
    %191 = vector.broadcast %190 : vector<64x1xf32> to vector<64x64xf32>
    %192 = arith.subf %188, %191 : vector<64x64xf32>
    %193 = math.exp %192 : vector<64x64xf32>
    %cst_91 = arith.constant dense<0.000000e+00> : vector<64xf32>
    %194 = vector.multi_reduction <add>, %193, %cst_91 [1] : vector<64x64xf32> to vector<64xf32>
    %195 = vector.shape_cast %194 : vector<64xf32> to vector<64x1xf32>
    %196 = tpu.reciprocal %195 {approx = true} : vector<64x1xf32> -> vector<64x1xf32>
    %197 = vector.broadcast %196 : vector<64x1xf32> to vector<64x64xf32>
    %198 = arith.mulf %193, %197 : vector<64x64xf32>
    %199 = arith.truncf %198 : vector<64x64xf32> to vector<64x64xbf16>
    %200 = arith.truncf %182 : vector<64x8xf32> to vector<64x8xbf16>
    %cst_92 = arith.constant dense<0.000000e+00> : vector<64x8xf32>
    %201 = tpu.matmul %199, %200, %cst_92 {dimension_numbers = #tpu.dot_dimension_numbers<[1], [0], [0], [1], [0, 0, 1, 1], [], []>} : vector<64x64xbf16>, vector<64x8xbf16>, vector<64x8xf32> -> vector<64x8xf32>
    %202 = vector.extract_strided_slice %201 {offsets = [0, 0], sizes = [16, 8], strides = [1, 1]} : vector<64x8xf32> to vector<16x8xf32>
    %203 = vector.extract_strided_slice %201 {offsets = [16, 0], sizes = [16, 8], strides = [1, 1]} : vector<64x8xf32> to vector<16x8xf32>
    %204 = vector.extract_strided_slice %201 {offsets = [32, 0], sizes = [16, 8], strides = [1, 1]} : vector<64x8xf32> to vector<16x8xf32>
    %205 = vector.extract_strided_slice %201 {offsets = [48, 0], sizes = [16, 8], strides = [1, 1]} : vector<64x8xf32> to vector<16x8xf32>
    %206 = tpu.concatenate %202, %203, %204, %205 in 1 : vector<16x8xf32>, vector<16x8xf32>, vector<16x8xf32>, vector<16x8xf32> -> vector<16x32xf32>
    %207 = arith.truncf %206 : vector<16x32xf32> to vector<16x32xbf16>
    %cst_93 = arith.constant dense<0.000000e+00> : vector<16x32xf32>
    %208 = tpu.matmul %207, %143, %cst_93 {dimension_numbers = #tpu.dot_dimension_numbers<[1], [0], [0], [1], [0, 0, 1, 1], [], []>} : vector<16x32xbf16>, vector<32x32xbf16>, vector<16x32xf32> -> vector<16x32xf32>
    %209 = vector.broadcast %151 : vector<1x32xf32> to vector<16x32xf32>
    %210 = arith.addf %208, %209 : vector<16x32xf32>
    %211 = arith.addf %139, %210 : vector<16x32xf32>
    %cst_94 = arith.constant dense<0.000000e+00> : vector<16xf32>
    %212 = vector.multi_reduction <add>, %211, %cst_94 [1] : vector<16x32xf32> to vector<16xf32>
    %213 = vector.shape_cast %212 : vector<16xf32> to vector<16x1xf32>
    %cst_95 = arith.constant 3.200000e+01 : f32
    %214 = vector.broadcast %cst_95 : f32 to vector<16x1xf32>
    %215 = arith.divf %213, %214 : vector<16x1xf32>
    %216 = vector.broadcast %215 : vector<16x1xf32> to vector<16x32xf32>
    %217 = arith.subf %211, %216 : vector<16x32xf32>
    %218 = arith.mulf %217, %217 : vector<16x32xf32>
    %cst_96 = arith.constant dense<0.000000e+00> : vector<16xf32>
    %219 = vector.multi_reduction <add>, %218, %cst_96 [1] : vector<16x32xf32> to vector<16xf32>
    %220 = vector.shape_cast %219 : vector<16xf32> to vector<16x1xf32>
    %cst_97 = arith.constant 3.200000e+01 : f32
    %221 = vector.broadcast %cst_97 : f32 to vector<16x1xf32>
    %222 = arith.divf %220, %221 : vector<16x1xf32>
    %223 = vector.broadcast %215 : vector<16x1xf32> to vector<16x32xf32>
    %224 = arith.subf %211, %223 : vector<16x32xf32>
    %cst_98 = arith.constant 9.99999996E-13 : f32
    %225 = vector.broadcast %cst_98 : f32 to vector<16x1xf32>
    %226 = arith.addf %222, %225 : vector<16x1xf32>
    %227 = math.rsqrt %226 : vector<16x1xf32>
    %228 = vector.broadcast %227 : vector<16x1xf32> to vector<16x32xf32>
    %229 = arith.mulf %224, %228 : vector<16x32xf32>
    %230 = vector.broadcast %157 : vector<1x32xf32> to vector<16x32xf32>
    %231 = arith.mulf %229, %230 : vector<16x32xf32>
    %232 = vector.broadcast %159 : vector<1x32xf32> to vector<16x32xf32>
    %233 = arith.addf %231, %232 : vector<16x32xf32>
    %234 = arith.truncf %233 : vector<16x32xf32> to vector<16x32xbf16>
    %cst_99 = arith.constant dense<0.000000e+00> : vector<16x64xf32>
    %235 = tpu.matmul %234, %145, %cst_99 {dimension_numbers = #tpu.dot_dimension_numbers<[1], [0], [0], [1], [0, 0, 1, 1], [], []>} : vector<16x32xbf16>, vector<32x64xbf16>, vector<16x64xf32> -> vector<16x64xf32>
    %236 = vector.broadcast %153 : vector<1x64xf32> to vector<16x64xf32>
    %237 = arith.addf %235, %236 : vector<16x64xf32>
    %cst_100 = arith.constant 5.000000e-01 : f32
    %238 = vector.broadcast %cst_100 : f32 to vector<16x64xf32>
    %239 = arith.mulf %238, %237 : vector<16x64xf32>
    %cst_101 = arith.constant 4.471500e-02 : f32
    %240 = vector.broadcast %cst_101 : f32 to vector<16x64xf32>
    %241 = arith.mulf %240, %237 : vector<16x64xf32>
    %242 = arith.mulf %241, %237 : vector<16x64xf32>
    %243 = arith.mulf %242, %237 : vector<16x64xf32>
    %244 = arith.addf %237, %243 : vector<16x64xf32>
    %cst_102 = arith.constant 0.797884583 : f32
    %245 = vector.broadcast %cst_102 : f32 to vector<16x64xf32>
    %246 = arith.mulf %245, %244 : vector<16x64xf32>
    %247 = math.tanh %246 : vector<16x64xf32>
    %cst_103 = arith.constant 1.000000e+00 : f32
    %248 = vector.broadcast %cst_103 : f32 to vector<16x64xf32>
    %249 = arith.addf %248, %247 : vector<16x64xf32>
    %250 = arith.mulf %239, %249 : vector<16x64xf32>
    %251 = arith.truncf %250 : vector<16x64xf32> to vector<16x64xbf16>
    %cst_104 = arith.constant dense<0.000000e+00> : vector<16x32xf32>
    %252 = tpu.matmul %251, %147, %cst_104 {dimension_numbers = #tpu.dot_dimension_numbers<[1], [0], [0], [1], [0, 0, 1, 1], [], []>} : vector<16x64xbf16>, vector<64x32xbf16>, vector<16x32xf32> -> vector<16x32xf32>
    %253 = vector.broadcast %155 : vector<1x32xf32> to vector<16x32xf32>
    %254 = arith.addf %252, %253 : vector<16x32xf32>
    %255 = arith.addf %233, %254 : vector<16x32xf32>
    %cst_105 = arith.constant dense<0.000000e+00> : vector<16xf32>
    %256 = vector.multi_reduction <add>, %255, %cst_105 [1] : vector<16x32xf32> to vector<16xf32>
    %257 = vector.shape_cast %256 : vector<16xf32> to vector<16x1xf32>
    %cst_106 = arith.constant 3.200000e+01 : f32
    %258 = vector.broadcast %cst_106 : f32 to vector<16x1xf32>
    %259 = arith.divf %257, %258 : vector<16x1xf32>
    %260 = vector.broadcast %259 : vector<16x1xf32> to vector<16x32xf32>
    %261 = arith.subf %255, %260 : vector<16x32xf32>
    %262 = arith.mulf %261, %261 : vector<16x32xf32>
    %cst_107 = arith.constant dense<0.000000e+00> : vector<16xf32>
    %263 = vector.multi_reduction <add>, %262, %cst_107 [1] : vector<16x32xf32> to vector<16xf32>
    %264 = vector.shape_cast %263 : vector<16xf32> to vector<16x1xf32>
    %cst_108 = arith.constant 3.200000e+01 : f32
    %265 = vector.broadcast %cst_108 : f32 to vector<16x1xf32>
    %266 = arith.divf %264, %265 : vector<16x1xf32>
    %267 = vector.broadcast %259 : vector<16x1xf32> to vector<16x32xf32>
    %268 = arith.subf %255, %267 : vector<16x32xf32>
    %cst_109 = arith.constant 9.99999996E-13 : f32
    %269 = vector.broadcast %cst_109 : f32 to vector<16x1xf32>
    %270 = arith.addf %266, %269 : vector<16x1xf32>
    %271 = math.rsqrt %270 : vector<16x1xf32>
    %272 = vector.broadcast %271 : vector<16x1xf32> to vector<16x32xf32>
    %273 = arith.mulf %268, %272 : vector<16x32xf32>
    %274 = vector.broadcast %161 : vector<1x32xf32> to vector<16x32xf32>
    %275 = arith.mulf %273, %274 : vector<16x32xf32>
    %276 = vector.broadcast %163 : vector<1x32xf32> to vector<16x32xf32>
    %277 = arith.addf %275, %276 : vector<16x32xf32>
    %c0_110 = arith.constant 0 : index
    %c0_111 = arith.constant 0 : index
    %278 = vector.load %arg5[%c0_110, %c0_111] : memref<2x16xf32, #tpu.memory_space<vmem>>, vector<2x16xf32>
    %279 = arith.truncf %278 : vector<2x16xf32> to vector<2x16xbf16>
    %280 = arith.truncf %277 : vector<16x32xf32> to vector<16x32xbf16>
    %cst_112 = arith.constant dense<0.000000e+00> : vector<2x32xf32>
    %281 = tpu.matmul %279, %280, %cst_112 {dimension_numbers = #tpu.dot_dimension_numbers<[1], [0], [0], [1], [0, 0, 1, 1], [], []>} : vector<2x16xbf16>, vector<16x32xbf16>, vector<2x32xf32> -> vector<2x32xf32>
    %c0_113 = arith.constant 0 : index
    %c0_114 = arith.constant 0 : index
    %282 = vector.load %arg6[%c0_113, %c0_114] : memref<2x32xf32, #tpu.memory_space<vmem>>, vector<2x32xf32>
    tpu.vector_store %arg6[%c0_113, %c0_114], %281 {strides = array<i32>} : memref<2x32xf32, #tpu.memory_space<vmem>>, vector<2x32xf32>,
    return
  }
  func.func @transform_0(%arg0: i32) -> (i32, i32) {
    %c0_i32 = arith.constant 0 : i32
    %c0_i32_0 = arith.constant 0 : i32
    %c0_i32_1 = arith.constant 0 : i32
    return %c0_i32, %c0_i32_0 : i32, i32
  }
  func.func @transform_1(%arg0: i32) -> (i32, i32, i32) {
    %c0_i32 = arith.constant 0 : i32
    %c0_i32_0 = arith.constant 0 : i32
    %c0_i32_1 = arith.constant 0 : i32
    %c0_i32_2 = arith.constant 0 : i32
    return %c0_i32, %c0_i32_0, %c0_i32_1 : i32, i32, i32
  }
  func.func @transform_2(%arg0: i32) -> (i32, i32, i32) {
    %c0_i32 = arith.constant 0 : i32
    %c0_i32_0 = arith.constant 0 : i32
    %c0_i32_1 = arith.constant 0 : i32
    %c0_i32_2 = arith.constant 0 : i32
    return %c0_i32, %c0_i32_0, %c0_i32_1 : i32, i32, i32
  }
  func.func @transform_3(%arg0: i32) -> (i32, i32) {
    %c0_i32 = arith.constant 0 : i32
    %c0_i32_0 = arith.constant 0 : i32
    %c0_i32_1 = arith.constant 0 : i32
    return %c0_i32, %c0_i32_0 : i32, i32
  }
  func.func @transform_4(%arg0: i32) -> (i32, i32) {
    %c0_i32 = arith.constant 0 : i32
    %c0_i32_0 = arith.constant 0 : i32
    %c0_i32_1 = arith.constant 0 : i32
    return %c0_i32, %c0_i32_0 : i32, i32
  }
  func.func @transform_5(%arg0: i32) -> (i32, i32) {
    %c0_i32 = arith.constant 0 : i32
    %c0_i32_0 = arith.constant 0 : i32
    %c0_i32_1 = arith.constant 0 : i32
    return %c0_i32, %c0_i32_0 : i32, i32
  }
}

</mosaic_0001>

<bundles_post_ra>
// kernel: tpu_custom_call.1
= control target key start
LH: loop header
LB: loop body
LE: loop exit
PB: predicated region body
PF: predicated region fallthrough
CT: control target
= control target key end

     0   :  { %10 = vsyncpa [#allocation3], 0  ;;  %s2030_s0 = inlined_call_operand.hbm [shape: f32[16,32], index: 0, kind: input, shape index: {}]   ;;  %s2031_s1 = inlined_call_operand.hbm [shape: bf16[2,160,128], index: 1, kind: input, shape index: {}]   ;;  %s2032_s2 = inlined_call_operand.hbm [shape: f32[2,8,128], index: 2, kind: input, shape index: {}]   ;;  %s2033_s3 = inlined_call_operand.hbm [shape: f32[64,64], index: 3, kind: input, shape index: {}]   ;;  %s2034_s4 = inlined_call_operand.vmem [shape: f32[2,16], index: 4, kind: input, shape index: {}]   ;;  %s2035_s5 = inlined_call_operand.hbm [shape: f32[2,32], index: 5, kind: output, shape index: {}]  }
   0x1   :  { %11 = vsyncpa [#allocation6], 0 }
   0x2   :  { %12 = vsyncpa [#allocation9], 0  ;;  %s31_s20 = sshll.u32 %s2031_s1, 4  ;;  %s32_s20 = int_to_ptr.hbm [resolvable:$true] %s31_s20 }
   0x3   :  { %13 = vsyncpa [#allocation4], 0  ;;  %s1716_s21 = smov [#allocation5]   ;;  %s18_s25 = sshll.u32 %s2030_s0, 4  ;;  %s19_s25 = int_to_ptr.hbm [resolvable:$true] %s18_s25 }
   0x4   :  { %s33_s22 = sshll.u32 %s1716_s21, 4  ;;  %s1717_s26 = smov 64   ;;  %s34_s22 = int_to_ptr.vmem [resolvable:$true] %s33_s22 }
   0x5   :  { %s1718_s27 = smov 4   ;;  %s1719_s28 = smov [#allocation2]  }
   0x6   :  { %39 = dma.hbm_to_vmem [thread:$0]  %s32_s20, 2560, %s34_s22, [#allocation6], %s1717_s26, %s1717_s26, %s1718_s27  }
   0x7   :  { %s20_s29 = sshll.u32 %s1719_s28, 4  ;;  %s1720_s30 = smov 128   ;;  %s21_s29 = int_to_ptr.vmem [resolvable:$true] %s20_s29 }
   0x8   :  { %s1721_s1 = smov 8   ;;  %s44_s8 = sshll.u32 %s2032_s2, 4  ;;  %s45_s8 = int_to_ptr.hbm [resolvable:$true] %s44_s8 }
   0x9   :  { %26 = dma.hbm_to_vmem [thread:$0]  %s19_s25, 256, %s21_s29, [#allocation3], %s1720_s30, %s1720_s30, %s1721_s1  }
   0xa   :  { %s1722_s9 = smov [#allocation7]   ;;  %s57_s12 = sshll.u32 %s2033_s3, 4  ;;  %s58_s12 = int_to_ptr.hbm [resolvable:$true] %s57_s12 }
   0xb   :  { %s46_s0 = sshll.u32 %s1722_s9, 4  ;;  %s1723_s13 = smov [#allocation8]   ;;  %s47_s0 = int_to_ptr.vmem [resolvable:$true] %s46_s0 }
   0xc   :  { %52 = dma.hbm_to_vmem [thread:$0]  %s45_s8, 256, %s47_s0, [#allocation6], %s1720_s30, %s1720_s30, %s1721_s1  }
   0xd   :  { %s59_s14 = sshll.u32 %s1723_s13, 4  ;;  %s60_s14 = int_to_ptr.vmem [resolvable:$true] %s59_s14 }
   0xe   :  { %65 = dma.hbm_to_vmem [thread:$0]  %s58_s12, 1024, %s60_s14, [#allocation9], %s1720_s30, %s1720_s30, %s1721_s1  }
   0xf   :  { %1708 = dma.done.wait [#allocation3], 256  }
  0x10   :  { %1709 = vsyncadd [#allocation3], 4294967040 }
  0x11   :  { %1710 = dma.done.wait [#allocation6], 2816  }
  0x12   :  { %1711 = vsyncadd [#allocation6], 4294964480 }
  0x13   :  { %1712 = dma.done.wait [#allocation9], 1024  }
  0x14   :  { %1713 = vsyncadd [#allocation9], 4294966272  ;;  %v1387_v0 = vld [vmem:[#allocation5 + $0x8] sm:$0xff]  ;;  %v1386_v1 = vld [vmem:[#allocation5] sm:$0xff]  ;;  %vm137_vm0 = vcmask 261120   ;;  %s1724_s2 = smov 120  }
  0x15   :  { %v1779_v2 = vld [vmem:[#allocation2] sm:$0xff]  ;;  %v1781_v3 = vld [vmem:[#allocation2 + $0x8] sm:$0xff]  ;;  %147 = vmatpush.bf16.msra.mxu0 %v1387_v0  ;;  %v1482_v6 = vld [vmem:[#allocation7] ss:$0 sm:$0xff]  ;;  %s1725_s3 = smov 104   ;;  %s1726_s15 = smov 112  }
  0x16   :  { %v123_v4 = vpack.c.bf16 %v1781_v3, %v1779_v2  ;;  %s1727_s16 = smov 96   ;;  %vm191_vm1 = vcmask 64512   ;;  %v1814_v34 = vld [vmem:[#allocation8] sm:$0xff]  ;;  %vm261_vm2 = vcmask 523264   ;;  %v1818_v39 = vld [vmem:[#allocation8 + $0x8] sm:$0xff]  ;;  %v1822_v44 = vld [vmem:[#allocation8 + $0x10] sm:$0xff] }
  0x17   :  { %v1829_v49 = vld [vmem:[#allocation8 + $0x18] sm:$0xff]  ;;  %v1833_v54 = vld [vmem:[#allocation8 + $0x20] sm:$0xff]  ;;  %v1840_v59 = vld [vmem:[#allocation8 + $0x28] sm:$0xff]  ;;  %s1728_s17 = smov 16   ;;  %s1729_s18 = smov 24   ;;  %vm433_vm3 = vcmask 130048  }
  0x18   :  { %v1844_v0 = vld [vmem:[#allocation8 + $0x30] sm:$0xff]  ;;  %vm436_vm4 = vcmask 195584   ;;  %s1731_s21 = smov [#allocation10]   ;;  %s1269_s25 = sshll.u32 %s2035_s5, 4  ;;  %s1270_s25 = int_to_ptr.hbm [resolvable:$true] %s1269_s25 }
  0x19   :  { %148 = vmatpush.bf16.msra.mxu0 %v1386_v1  ;;  %s1267_s22 = sshll.u32 %s1731_s21, 4  ;;  %s1268_s22 = int_to_ptr.vmem [resolvable:$true] %s1267_s22 }
  0x1c   :  { %1289 = vmatmul.msk.bf16.vlgmr.msra.gmra.mxu0 %vm137_vm0, %v123_v4 }
  0x99   :  { %v150_v5 = vpop.f32.mrf.mxu0 }
  0x9a   :  { %v151_v8 = vadd.f32 %v1482_v6, %v150_v5 }
  0xa1   :  { %v152_v7 = vpop.f32.mrf.mxu0 }
  0xa2   :  { %v153_v9 = vadd.f32 %v1482_v6, %v152_v7  ;;  %v1848_v7 = vld [vmem:[#allocation8 + $0x38] sm:$0xff] }
  0xa4   :  { %v1432_v10 = vpack.i.bf16 %v153_v9, %v151_v8  ;;  %v1789_v11 = vpack.c.bf16 %v153_v9, %v151_v8 }
  0xa6   :  { %1433 = vrot.lane.b32.xlu1 %v1432_v10, %s1724_s2  ;;  %1423 = vrot.lane.b32.xlu0 %v1432_v10, %s1725_s3 }
  0xae   :  { %1428 = vrot.lane.b32.xlu0 %v1432_v10, %s1726_s15 }
  0xb6   :  { %183 = vrot.lane.b32.xlu0 %v1789_v11, %s1727_s16 }
 0x118   :  { %v1424_v12 = vpop.permute.xlu0 %1423  ;;  %v1434_v20 = vpop.permute.xlu1 %1433 }
 0x119   :  { %v1426_v13 = vunpack.i.h.bf16 %v1424_v12  ;;  %v1425_v14 = vunpack.i.l.bf16 %v1424_v12  ;;  %v1436_v21 = vunpack.i.h.bf16 %v1434_v20  ;;  %v1435_v22 = vunpack.i.l.bf16 %v1434_v20 }
 0x11b   :  { %v178_v15 = vpack.c.bf16 %v1426_v13, %v1425_v14  ;;  %v1798_v23 = vpack.c.bf16 %v1436_v21, %v1435_v22 }
 0x11d   :  { %189 = vrot.lane.b32.xlu1 %v178_v15, %s1727_s16 }
 0x120   :  { %v1429_v16 = vpop.permute.xlu0 %1428 }
 0x121   :  { %v1431_v17 = vunpack.i.h.bf16 %v1429_v16  ;;  %v1430_v18 = vunpack.i.l.bf16 %v1429_v16 }
 0x123   :  { %v1794_v19 = vpack.c.bf16 %v1431_v17, %v1430_v18 }
 0x125   :  { %187 = vrot.lane.b32.xlu2 %v1794_v19, %s1727_s16 }
 0x128   :  { %v184_v31 = vpop.permute.xlu0 %183 }
 0x129   :  { %v205_v32 = vsel %vm191_vm1, %v184_v31, 0 }
 0x12d   :  { %185 = vrot.lane.b32.xlu2 %v1798_v23, %s1727_s16 }
 0x135   :  { %360 = vrot.lane.b32.xlu2 %v178_v15, %s1717_s26 }
 0x17f   :  { %v188_v24 = vpop.permute.xlu2 %187 }
 0x180   :  { %v211_v29 = vsel %vm191_vm1, %v188_v24, 0 }
 0x187   :  { %v186_v25 = vpop.permute.xlu2 %185 }
 0x188   :  { %v208_v30 = vsel %vm191_vm1, %v186_v25, 0 }
 0x18f   :  { %v361_v26 = vpop.permute.xlu2 %360  ;;  %v190_v27 = vpop.permute.xlu1 %189 }
 0x190   :  { %382 = vmatpush.bf16.msra.mxu2 %v361_v26  ;;  %v214_v28 = vsel %vm191_vm1, %v190_v27, 0 }
 0x191   :  { %220 = vmatpush.bf16.xpose.msra.mxu1 %v214_v28 }
 0x199   :  { %221 = vmatpush.bf16.xpose.msra.mxu1 %v211_v29 }
 0x1a1   :  { %222 = vmatpush.bf16.xpose.msra.mxu1 %v208_v30 }
 0x1a9   :  { %223 = vmatpush.bf16.xpose.msra.mxu1 %v205_v32 }
 0x1b0   :  { %1290 = vmatmul.msk.bf16.vlgmr.msra.gmra.mxu1 %vm191_vm1, %v1789_v11 }
 0x1c0   :  { %1291 = vmatmul.msk.bf16.gmra.mxu1 %vm191_vm1, %v1798_v23 }
 0x1d0   :  { %1292 = vmatmul.msk.bf16.gmra.mxu1 %vm191_vm1, %v1794_v19 }
 0x1e0   :  { %1293 = vmatmul.msk.bf16.gmra.mxu1 %vm191_vm1, %v178_v15 }
 0x22d   :  { %v225_v33 = vpop.f32.mrf.mxu1 }
 0x22e   :  { %v245_v35 = vmul.f32 0.35355338, %v225_v33 }
 0x230   :  { %v253_v36 = vadd.f32 %v245_v35, %v1814_v34 }
 0x232   :  { %v262_v37 = vsel %vm261_vm2, %v253_v36, -inf }
 0x233   :  { %263 = vmax.xlane.f32.xlu1 %v262_v37 }
 0x235   :  { %v227_v38 = vpop.f32.mrf.mxu1 }
 0x236   :  { %v246_v40 = vmul.f32 0.35355338, %v227_v38 }
 0x238   :  { %v254_v41 = vadd.f32 %v246_v40, %v1818_v39 }
 0x23a   :  { %v265_v42 = vsel %vm261_vm2, %v254_v41, -inf }
 0x23b   :  { %266 = vmax.xlane.f32.xlu2 %v265_v42 }
 0x23d   :  { %v230_v43 = vpop.f32.mrf.mxu1 }
 0x23e   :  { %v247_v45 = vmul.f32 0.35355338, %v230_v43 }
 0x240   :  { %v1825_v46 = vadd.f32 %v247_v45, %v1822_v44 }
 0x242   :  { %v268_v47 = vsel %vm261_vm2, %v1825_v46, -inf }
 0x243   :  { %269 = vmax.xlane.f32.xlu0 %v268_v47 }
 0x245   :  { %v232_v48 = vpop.f32.mrf.mxu1 }
 0x246   :  { %v248_v50 = vmul.f32 0.35355338, %v232_v48 }
 0x248   :  { %v256_v51 = vadd.f32 %v248_v50, %v1829_v49 }
 0x24a   :  { %v271_v52 = vsel %vm261_vm2, %v256_v51, -inf }
 0x24b   :  { %272 = vmax.xlane.f32.xlu2 %v271_v52 }
 0x24d   :  { %v235_v53 = vpop.f32.mrf.mxu1 }
 0x24e   :  { %v249_v55 = vmul.f32 0.35355338, %v235_v53 }
 0x250   :  { %v1836_v56 = vadd.f32 %v249_v55, %v1833_v54 }
 0x252   :  { %v274_v57 = vsel %vm261_vm2, %v1836_v56, -inf }
 0x253   :  { %275 = vmax.xlane.f32.xlu1 %v274_v57 }
 0x255   :  { %v237_v58 = vpop.f32.mrf.mxu1 }
 0x256   :  { %v250_v60 = vmul.f32 0.35355338, %v237_v58 }
 0x258   :  { %v258_v61 = vadd.f32 %v250_v60, %v1840_v59 }
 0x25a   :  { %v277_v62 = vsel %vm261_vm2, %v258_v61, -inf }
 0x25b   :  { %278 = vmax.xlane.f32.xlu2 %v277_v62 }
 0x25d   :  { %v240_v63 = vpop.f32.mrf.mxu1 }
 0x25e   :  { %v251_v1 = vmul.f32 0.35355338, %v240_v63 }
 0x260   :  { %v259_v4 = vadd.f32 %v251_v1, %v1844_v0 }
 0x262   :  { %v280_v5 = vsel %vm261_vm2, %v259_v4, -inf }
 0x263   :  { %281 = vmax.xlane.f32.xlu0 %v280_v5 }
 0x265   :  { %v242_v6 = vpop.f32.mrf.mxu1 }
 0x266   :  { %v252_v8 = vmul.f32 0.35355338, %v242_v6 }
 0x268   :  { %v260_v9 = vadd.f32 %v252_v8, %v1848_v7 }
 0x26a   :  { %v283_v10 = vsel %vm261_vm2, %v260_v9, -inf }
 0x26b   :  { %284 = vmax.xlane.f32.xlu1 %v283_v10 }
 0x273   :  { %354 = vrot.lane.b32.xlu2 %v1789_v11, %s1717_s26 }
 0x2a6   :  { %v264_v12 = vpop.xlane.xlu1 %263 }
 0x2a7   :  { %v286_v13 = vsub.f32 %v253_v36, %v264_v12 }
 0x2a9   :  { %v294_v14 = vmul.f32 1.442695, %v286_v13 }
 0x2ab   :  { %1498 = vpow2.f32 %v294_v14 }
 0x2ae   :  { %v267_v15 = vpop.xlane.xlu2 %266 }
 0x2af   :  { %v287_v16 = vsub.f32 %v254_v41, %v267_v15 }
 0x2b1   :  { %v1854_v17 = vpop.eup %1498  ;;  %v296_v18 = vmul.f32 1.442695, %v287_v16 }
 0x2b2   :  { %v310_v20 = vsel %vm261_vm2, %v1854_v17, 0.0 }
 0x2b3   :  { %1500 = vpow2.f32 %v296_v18  ;;  %311 = vadd.xlane.f32.xlu0 %v310_v20 }
 0x2b6   :  { %v270_v28 = vpop.xlane.xlu0 %269 }
 0x2b7   :  { %v288_v32 = vsub.f32 %v1825_v46, %v270_v28 }
 0x2b9   :  { %v1501_v21 = vpop.eup %1500 }
 0x2ba   :  { %v313_v22 = vsel %vm261_vm2, %v1501_v21, 0.0 }
 0x2bb   :  { %314 = vadd.xlane.f32.xlu1 %v313_v22 }
 0x2be   :  { %v273_v24 = vpop.xlane.xlu2 %272 }
 0x2bf   :  { %v289_v11 = vsub.f32 %v256_v51, %v273_v24 }
 0x2c1   :  { %v300_v25 = vmul.f32 1.442695, %v289_v11 }
 0x2c3   :  { %1502 = vpow2.f32 %v300_v25 }
 0x2c6   :  { %v276_v38 = vpop.xlane.xlu1 %275 }
 0x2c7   :  { %358 = vrot.lane.b32.xlu0 %v1794_v19, %s1717_s26  ;;  %v298_v19 = vmul.f32 1.442695, %v288_v32 }
 0x2c9   :  { %v1503_v26 = vpop.eup %1502 }
 0x2ca   :  { %v319_v27 = vsel %vm261_vm2, %v1503_v26, 0.0 }
 0x2cb   :  { %320 = vadd.xlane.f32.xlu2 %v319_v27 }
 0x2ce   :  { %v279_v36 = vpop.xlane.xlu2 %278 }
 0x2cf   :  { %v291_v37 = vsub.f32 %v258_v61, %v279_v36 }
 0x2d1   :  { %v304_v40 = vmul.f32 1.442695, %v291_v37 }
 0x2d4   :  { %356 = vrot.lane.b32.xlu1 %v1798_v23, %s1717_s26  ;;  %v290_v23 = vsub.f32 %v1836_v56, %v276_v38 }
 0x2d6   :  { %v282_v29 = vpop.xlane.xlu0 %281  ;;  %v302_v42 = vmul.f32 1.442695, %v290_v23  ;;  %v355_v1 = vpop.permute.xlu2 %354 }
 0x2d7   :  { %v292_v30 = vsub.f32 %v259_v4, %v282_v29 }
 0x2d9   :  { %v306_v31 = vmul.f32 1.442695, %v292_v30 }
 0x2db   :  { %1504 = vpow2.f32 %v306_v31 }
 0x2dc   :  { %1506 = vpow2.f32 %v298_v19 }
 0x2dd   :  { %1508 = vpow2.f32 %v304_v40 }
 0x2de   :  { %v285_v45 = vpop.xlane.xlu1 %284  ;;  %1510 = vpow2.f32 %v302_v42  ;;  %v1388_v42 = vld [vmem:[#allocation5 + $0x10] sm:$0xff] }
 0x2df   :  { %v293_v46 = vsub.f32 %v260_v9, %v285_v45 }
 0x2e1   :  { %v1865_v33 = vpop.eup %1504  ;;  %v308_v48 = vmul.f32 1.442695, %v293_v46 }
 0x2e2   :  { %v328_v35 = vsel %vm261_vm2, %v1865_v33, 0.0  ;;  %v1507_v41 = vpop.eup %1506 }
 0x2e3   :  { %329 = vadd.xlane.f32.xlu2 %v328_v35  ;;  %v316_v43 = vsel %vm261_vm2, %v1507_v41, 0.0  ;;  %v1509_v47 = vpop.eup %1508  ;;  %1512 = vpow2.f32 %v308_v48 }
 0x2e4   :  { %v325_v50 = vsel %vm261_vm2, %v1509_v47, 0.0  ;;  %v1511_v51 = vpop.eup %1510 }
 0x2e5   :  { %v322_v52 = vsel %vm261_vm2, %v1511_v51, 0.0 }
 0x2e9   :  { %v1513_v53 = vpop.eup %1512 }
 0x2ea   :  { %v331_v55 = vsel %vm261_vm2, %v1513_v53, 0.0 }
 0x2f1   :  { %317 = vadd.xlane.f32.xlu0 %v316_v43 }
 0x2f9   :  { %326 = vadd.xlane.f32.xlu0 %v325_v50 }
 0x2fe   :  { %323 = vadd.xlane.f32.xlu1 %v322_v52 }
 0x306   :  { %332 = vadd.xlane.f32.xlu1 %v331_v55 }
 0x326   :  { %v312_v56 = vpop.xlane.xlu0 %311 }
 0x32e   :  { %v315_v58 = vpop.xlane.xlu1 %314 }
 0x32f   :  { %1514 = vrcp.f32 %v315_v58 }
 0x330   :  { %1516 = vrcp.f32 %v312_v56 }
 0x335   :  { %v1515_v60 = vpop.eup %1514 }
 0x336   :  { %v1517_v62 = vpop.eup %1516  ;;  %v343_v63 = vmul.f32 %v1515_v60, %v1501_v21 }
 0x337   :  { %v342_v4 = vmul.f32 %v1517_v62, %v1854_v17 }
 0x339   :  { %v359_v57 = vpop.permute.xlu0 %358  ;;  %v350_v5 = vpack.c.bf16 %v343_v63, %v342_v4  ;;  %v1483_v63 = vld [vmem:[#allocation7 + $0x1] ss:$0 sm:$0xff] }
 0x33a   :  { %383 = vmatpush.bf16.msra.mxu2 %v359_v57 }
 0x33e   :  { %v321_v6 = vpop.xlane.xlu2 %320 }
 0x33f   :  { %1518 = vrcp.f32 %v321_v6 }
 0x345   :  { %v1519_v9 = vpop.eup %1518 }
 0x346   :  { %v357_v61 = vpop.permute.xlu1 %356  ;;  %v345_v13 = vmul.f32 %v1519_v9, %v1503_v26 }
 0x347   :  { %384 = vmatpush.bf16.msra.mxu2 %v357_v61 }
 0x34b   :  { %385 = vmatpush.bf16.msra.mxu2 %v355_v1 }
 0x34e   :  { %1294 = vmatmul.msk.bf16.vlgmr.msra.gmra.mxu2 %vm261_vm2, %v350_v5 }
 0x356   :  { %v330_v11 = vpop.xlane.xlu2 %329 }
 0x364   :  { %v318_v8 = vpop.xlane.xlu0 %317 }
 0x365   :  { %1520 = vrcp.f32 %v318_v8 }
 0x36b   :  { %v1521_v10 = vpop.eup %1520 }
 0x36c   :  { %v344_v12 = vmul.f32 %v1521_v10, %v1507_v41  ;;  %v327_v15 = vpop.xlane.xlu0 %326 }
 0x36e   :  { %v351_v14 = vpack.c.bf16 %v345_v13, %v344_v12  ;;  %v1730_v13 = vmov 32.0  }
 0x370   :  { %1295 = vmatmul.msk.bf16.gmra.mxu2 %vm261_vm2, %v351_v14 }
 0x371   :  { %v324_v16 = vpop.xlane.xlu1 %323 }
 0x372   :  { %1522 = vrcp.f32 %v324_v16 }
 0x373   :  { %1524 = vrcp.f32 %v327_v15 }
 0x378   :  { %v1523_v17 = vpop.eup %1522 }
 0x379   :  { %v1525_v18 = vpop.eup %1524  ;;  %v346_v20 = vmul.f32 %v1523_v17, %v1511_v51  ;;  %v333_v22 = vpop.xlane.xlu1 %332 }
 0x37a   :  { %v347_v21 = vmul.f32 %v1525_v18, %v1509_v47  ;;  %1526 = vrcp.f32 %v333_v22 }
 0x37b   :  { %1528 = vrcp.f32 %v330_v11 }
 0x37c   :  { %v352_v24 = vpack.c.bf16 %v347_v21, %v346_v20  ;;  %1530 = vrcp.f32 %v1730_v13 }
 0x380   :  { %1296 = vmatmul.msk.bf16.gmra.mxu2 %vm261_vm2, %v352_v24  ;;  %v1527_v25 = vpop.eup %1526 }
 0x381   :  { %v1529_v26 = vpop.eup %1528  ;;  %v349_v27 = vmul.f32 %v1527_v25, %v1513_v53 }
 0x382   :  { %v348_v28 = vmul.f32 %v1529_v26, %v1865_v33  ;;  %v1389_v33 = vld [vmem:[#allocation5 + $0x18] sm:$0xff]  ;;  %v1531_v14 = vpop.eup %1530 }
 0x383   :  { %462 = vmatpush.bf16.msra.mxu3 %v1389_v33  ;;  %v479_v15 = vmul.f32 32.0, %v1531_v14  ;;  %vm483_vm5 = vweird.f32 %v1531_v14 }
 0x384   :  { %v353_v29 = vpack.c.bf16 %v349_v27, %v348_v28 }
 0x385   :  { %v480_v16 = vsub.f32 1.0, %v479_v15 }
 0x387   :  { %463 = vmatpush.bf16.msra.mxu3 %v1388_v42  ;;  %v481_v17 = vmul.f32 %v1531_v14, %v480_v16 }
 0x389   :  { %v482_v18 = vadd.f32 %v1531_v14, %v481_v17 }
 0x38b   :  { %v1894_v20 = vsel %vm483_vm5, %v1531_v14, %v482_v18 }
 0x390   :  { %1297 = vmatmul.msk.bf16.gmra.mxu2 %vm261_vm2, %v353_v29  ;;  %v1391_v29 = vld [vmem:[#allocation5 + $0x28] sm:$0xff] }
 0x391   :  { %552 = vmatpush.bf16.msrb.mxu0 %v1391_v29 }
 0x3d1   :  { %v387_v30 = vpop.f32.mrf.mxu2 }
 0x3d9   :  { %v389_v31 = vpop.f32.mrf.mxu2 }
 0x3f3   :  { %v392_v32 = vpop.f32.mrf.mxu2 }
 0x3fb   :  { %v394_v35 = vpop.f32.mrf.mxu2 }
 0x3fc   :  { %v1437_v19 = vpack.i.bf16 %v394_v35, %v392_v32 }
 0x3fe   :  { %1438 = vrot.lane.b32.xlu0 %v1437_v19, %s1721_s1 }
 0x403   :  { %v397_v36 = vpop.f32.mrf.mxu2 }
 0x40b   :  { %v399_v37 = vpop.f32.mrf.mxu2 }
 0x40c   :  { %v1442_v38 = vpack.i.bf16 %v399_v37, %v397_v36 }
 0x40e   :  { %1443 = vrot.lane.b32.xlu2 %v1442_v38, %s1728_s17 }
 0x413   :  { %v402_v40 = vpop.f32.mrf.mxu2 }
 0x41b   :  { %v404_v23 = vpop.f32.mrf.mxu2 }
 0x41c   :  { %v1447_v41 = vpack.i.bf16 %v404_v23, %v402_v40 }
 0x41e   :  { %1448 = vrot.lane.b32.xlu1 %v1447_v41, %s1729_s18 }
 0x468   :  { %v1444_v47 = vpop.permute.xlu2 %1443 }
 0x469   :  { %v1446_v51 = vunpack.i.h.bf16 %v1444_v47  ;;  %v1445_v52 = vunpack.i.l.bf16 %v1444_v47 }
 0x470   :  { %v1439_v43 = vpop.permute.xlu0 %1438 }
 0x471   :  { %v1441_v45 = vunpack.i.h.bf16 %v1439_v43  ;;  %v1440_v46 = vunpack.i.l.bf16 %v1439_v43 }
 0x473   :  { %v432_v48 = vsel %vm191_vm1, %v389_v31, %v1441_v45  ;;  %v431_v50 = vsel %vm191_vm1, %v387_v30, %v1440_v46  ;;  %v1390_v31 = vld [vmem:[#allocation5 + $0x20] sm:$0xff] }
 0x474   :  { %v434_v57 = vsel %vm433_vm3, %v431_v50, %v1445_v52  ;;  %v435_v58 = vsel %vm433_vm3, %v432_v48, %v1446_v51  ;;  %553 = vmatpush.bf16.msrb.mxu0 %v1390_v31  ;;  %v1484_v52 = vld [vmem:[#allocation7 + $0x4] ss:$0 sm:$0xff] }
 0x490   :  { %v1449_v53 = vpop.permute.xlu1 %1448 }
 0x491   :  { %v1451_v55 = vunpack.i.h.bf16 %v1449_v53  ;;  %v1450_v56 = vunpack.i.l.bf16 %v1449_v53 }
 0x493   :  { %v437_v60 = vsel %vm436_vm4, %v434_v57, %v1450_v56  ;;  %v438_v61 = vsel %vm436_vm4, %v435_v58, %v1451_v55  ;;  %v1485_v58 = vld [vmem:[#allocation7 + $0x5] ss:$0 sm:$0xff] }
 0x494   :  { %v439_v62 = vpack.c.bf16 %v438_v61, %v437_v60 }
 0x496   :  { %1306 = vmatmul.msk.bf16.vlgmr.msra.gmra.mxu3 %vm137_vm0, %v439_v62 }
 0x519   :  { %v465_v1 = vpop.f32.mrf.mxu3 }
 0x51a   :  { %v466_v4 = vadd.f32 %v1483_v63, %v465_v1  ;;  %v1395_v1 = vld [vmem:[#allocation5 + $0x48] sm:$0xff] }
 0x51b   :  { %611 = vmatpush.bf16.msrb.mxu3 %v1395_v1 }
 0x51c   :  { %v470_v5 = vadd.f32 %v466_v4, %v1779_v2  ;;  %v1394_v4 = vld [vmem:[#allocation5 + $0x40] sm:$0xff] }
 0x51e   :  { %v472_v6 = vsel %vm137_vm0, %v470_v5, 0.0 }
 0x51f   :  { %473 = vadd.xlane.f32.xlu0 %v472_v6  ;;  %612 = vmatpush.bf16.msrb.mxu3 %v1394_v4  ;;  %v1392_v6 = vld [vmem:[#allocation5 + $0x30] sm:$0xff] }
 0x521   :  { %v467_v8 = vpop.f32.mrf.mxu3 }
 0x522   :  { %v468_v9 = vadd.f32 %v1483_v63, %v467_v8  ;;  %v1486_v8 = vld [vmem:[#allocation7 + $0x2] ss:$0 sm:$0xff] }
 0x524   :  { %v471_v10 = vadd.f32 %v468_v9, %v1781_v3 }
 0x526   :  { %v475_v12 = vsel %vm137_vm0, %v471_v10, 0.0 }
 0x527   :  { %476 = vadd.xlane.f32.xlu2 %v475_v12 }
 0x592   :  { %v474_v2 = vpop.xlane.xlu0 %473 }
 0x593   :  { %v485_v21 = vmul.f32 %v1894_v20, %v474_v2 }
 0x595   :  { %v487_v22 = vsub.f32 %v470_v5, %v485_v21  ;;  %v1393_v5 = vld [vmem:[#allocation5 + $0x38] sm:$0xff] }
 0x596   :  { %613 = vmatpush.bf16.msrb.mxu3 %v1393_v5 }
 0x597   :  { %v489_v24 = vmul.f32 %v487_v22, %v487_v22 }
 0x599   :  { %v491_v3 = vsel %vm137_vm0, %v489_v24, 0.0 }
 0x59a   :  { %v477_v11 = vpop.xlane.xlu2 %476  ;;  %492 = vadd.xlane.f32.xlu1 %v491_v3  ;;  %614 = vmatpush.bf16.msrb.mxu3 %v1392_v6 }
 0x59b   :  { %v486_v25 = vmul.f32 %v1894_v20, %v477_v11 }
 0x59d   :  { %v488_v26 = vsub.f32 %v471_v10, %v486_v25 }
 0x59f   :  { %v490_v27 = vmul.f32 %v488_v26, %v488_v26 }
 0x5a1   :  { %v494_v28 = vsel %vm137_vm0, %v490_v27, 0.0 }
 0x5a2   :  { %495 = vadd.xlane.f32.xlu0 %v494_v28 }
 0x60d   :  { %v493_v30 = vpop.xlane.xlu1 %492 }
 0x60e   :  { %v497_v32 = vmul.f32 %v493_v30, %v1894_v20 }
 0x610   :  { %v499_v35 = vadd.f32 1e-12, %v497_v32 }
 0x612   :  { %1532 = vrsqrt.f32 %v499_v35  ;;  %vm507_vm7 = vweird.f32 %v499_v35 }
 0x615   :  { %v496_v19 = vpop.xlane.xlu0 %495 }
 0x616   :  { %v498_v36 = vmul.f32 %v496_v19, %v1894_v20 }
 0x618   :  { %v1533_v37 = vpop.eup %1532  ;;  %v500_v38 = vadd.f32 1e-12, %v498_v36 }
 0x619   :  { %v502_v40 = vmul.f32 %v1533_v37, %v499_v35  ;;  %vm508_vm6 = vweird.f32 %v1533_v37  ;;  %v1487_v35 = vld [vmem:[#allocation7 + $0x3] ss:$0 sm:$0xff] }
 0x61a   :  { %1534 = vrsqrt.f32 %v500_v38  ;;  %vm509_vm8 = vmor %vm507_vm7, %vm508_vm6  ;;  %vm517_vm10 = vweird.f32 %v500_v38 }
 0x61b   :  { %v503_v23 = vmul.f32 %v1533_v37, %v502_v40 }
 0x61d   :  { %v504_v41 = vmul.f32 0.5, %v503_v23 }
 0x61f   :  { %v505_v33 = vsub.f32 1.5, %v504_v41 }
 0x620   :  { %v1535_v42 = vpop.eup %1534 }
 0x621   :  { %v506_v43 = vmul.f32 %v1533_v37, %v505_v33  ;;  %v512_v45 = vmul.f32 %v1535_v42, %v500_v38  ;;  %vm518_vm9 = vweird.f32 %v1535_v42 }
 0x622   :  { %vm519_vm11 = vmor %vm517_vm10, %vm518_vm9 }
 0x623   :  { %v513_v46 = vmul.f32 %v1535_v42, %v512_v45  ;;  %v510_v47 = vsel %vm509_vm8, %v1533_v37, %v506_v43 }
 0x624   :  { %v521_v51 = vmul.f32 %v510_v47, %v487_v22 }
 0x625   :  { %v514_v48 = vmul.f32 0.5, %v513_v46 }
 0x626   :  { %v524_v57 = vmul.f32 %v1484_v52, %v521_v51 }
 0x627   :  { %v515_v50 = vsub.f32 1.5, %v514_v48 }
 0x628   :  { %v527_v61 = vadd.f32 %v1485_v58, %v524_v57 }
 0x629   :  { %v516_v53 = vmul.f32 %v1535_v42, %v515_v50 }
 0x62b   :  { %v520_v55 = vsel %vm519_vm11, %v1535_v42, %v516_v53 }
 0x62c   :  { %v522_v56 = vmul.f32 %v520_v55, %v488_v26  ;;  %v1397_v55 = vld [vmem:[#allocation5 + $0x58] sm:$0xff] }
 0x62d   :  { %726 = vmatpush.bf16.msra.mxu0 %v1397_v55 }
 0x62e   :  { %v525_v60 = vmul.f32 %v1484_v52, %v522_v56 }
 0x630   :  { %v528_v62 = vadd.f32 %v1485_v58, %v525_v60  ;;  %v1396_v58 = vld [vmem:[#allocation5 + $0x50] sm:$0xff] }
 0x631   :  { %727 = vmatpush.bf16.msra.mxu0 %v1396_v58 }
 0x632   :  { %v529_v63 = vpack.c.bf16 %v528_v62, %v527_v61 }
 0x634   :  { %1315 = vmatmul.msk.bf16.vlgmr.msrb.gmra.mxu0 %vm137_vm0, %v529_v63 }
 0x6b1   :  { %v555_v9 = vpop.f32.mrf.mxu0 }
 0x6b2   :  { %v556_v10 = vadd.f32 %v1486_v8, %v555_v9 }
 0x6b4   :  { %v562_v12 = vmul.f32 0.044715, %v556_v10  ;;  %v560_v27 = vmul.f32 0.5, %v556_v10 }
 0x6b6   :  { %v564_v13 = vmul.f32 %v562_v12, %v556_v10 }
 0x6b8   :  { %v566_v14 = vmul.f32 %v564_v13, %v556_v10 }
 0x6b9   :  { %v557_v15 = vpop.f32.mrf.mxu0 }
 0x6ba   :  { %v568_v16 = vadd.f32 %v566_v14, %v556_v10  ;;  %v558_v17 = vadd.f32 %v1486_v8, %v557_v15 }
 0x6bc   :  { %v563_v18 = vmul.f32 0.044715, %v558_v17  ;;  %v570_v2 = vmul.f32 0.7978846, %v568_v16  ;;  %v561_v28 = vmul.f32 0.5, %v558_v17 }
 0x6be   :  { %v565_v21 = vmul.f32 %v563_v18, %v558_v17  ;;  %1536 = vtanh.f32 %v570_v2 }
 0x6c0   :  { %v567_v22 = vmul.f32 %v565_v21, %v558_v17 }
 0x6c2   :  { %v569_v24 = vadd.f32 %v567_v22, %v558_v17  ;;  %v1488_v17 = vld [vmem:[#allocation7 + $0x6] ss:$0 sm:$0xff]  ;;  %v1489_v22 = vld [vmem:[#allocation7 + $0x7] ss:$0 sm:$0xff] }
 0x6c4   :  { %v571_v3 = vmul.f32 0.7978846, %v569_v24  ;;  %v1537_v11 = vpop.eup %1536 }
 0x6c5   :  { %v574_v25 = vadd.f32 1.0, %v1537_v11 }
 0x6c6   :  { %1538 = vtanh.f32 %v571_v3 }
 0x6c7   :  { %v576_v30 = vmul.f32 %v574_v25, %v560_v27 }
 0x6cc   :  { %v1539_v26 = vpop.eup %1538 }
 0x6cd   :  { %v575_v29 = vadd.f32 1.0, %v1539_v26 }
 0x6cf   :  { %v577_v31 = vmul.f32 %v575_v29, %v561_v28  ;;  %v1490_v29 = vld [vmem:[#allocation7 + $0x8] ss:$0 sm:$0xff] }
 0x6d1   :  { %v578_v32 = vpack.c.bf16 %v577_v31, %v576_v30 }
 0x6d3   :  { %1332 = vmatmul.msk.bf16.vlgmr.msrb.gmra.mxu3 %vm261_vm2, %v578_v32 }
 0x756   :  { %v616_v19 = vpop.f32.mrf.mxu3 }
 0x757   :  { %v617_v36 = vadd.f32 %v1487_v35, %v616_v19 }
 0x759   :  { %v621_v37 = vadd.f32 %v617_v36, %v527_v61 }
 0x75b   :  { %v623_v38 = vsel %vm137_vm0, %v621_v37, 0.0 }
 0x75c   :  { %624 = vadd.xlane.f32.xlu2 %v623_v38 }
 0x75e   :  { %v618_v40 = vpop.f32.mrf.mxu3 }
 0x75f   :  { %v619_v23 = vadd.f32 %v1487_v35, %v618_v40 }
 0x761   :  { %v622_v41 = vadd.f32 %v619_v23, %v528_v62 }
 0x763   :  { %v626_v33 = vsel %vm137_vm0, %v622_v41, 0.0 }
 0x764   :  { %627 = vadd.xlane.f32.xlu0 %v626_v33 }
 0x7cf   :  { %v625_v42 = vpop.xlane.xlu2 %624 }
 0x7d0   :  { %v629_v43 = vmul.f32 %v625_v42, %v1894_v20 }
 0x7d2   :  { %v631_v45 = vsub.f32 %v621_v37, %v629_v43 }
 0x7d4   :  { %v633_v46 = vmul.f32 %v631_v45, %v631_v45 }
 0x7d6   :  { %v635_v47 = vsel %vm137_vm0, %v633_v46, 0.0 }
 0x7d7   :  { %v628_v48 = vpop.xlane.xlu0 %627  ;;  %636 = vadd.xlane.f32.xlu1 %v635_v47 }
 0x7d8   :  { %v630_v50 = vmul.f32 %v628_v48, %v1894_v20 }
 0x7da   :  { %v632_v51 = vsub.f32 %v622_v41, %v630_v50 }
 0x7dc   :  { %v634_v52 = vmul.f32 %v632_v51, %v632_v51 }
 0x7de   :  { %v638_v53 = vsel %vm137_vm0, %v634_v52, 0.0 }
 0x7df   :  { %639 = vadd.xlane.f32.xlu2 %v638_v53 }
 0x84a   :  { %v637_v56 = vpop.xlane.xlu1 %636 }
 0x84b   :  { %v641_v57 = vmul.f32 %v637_v56, %v1894_v20 }
 0x84d   :  { %v643_v60 = vadd.f32 1e-12, %v641_v57 }
 0x84f   :  { %1540 = vrsqrt.f32 %v643_v60  ;;  %vm651_vm13 = vweird.f32 %v643_v60 }
 0x852   :  { %v640_v61 = vpop.xlane.xlu2 %639 }
 0x853   :  { %v642_v62 = vmul.f32 %v640_v61, %v1894_v20 }
 0x855   :  { %v1541_v63 = vpop.eup %1540  ;;  %v644_v1 = vadd.f32 1e-12, %v642_v62 }
 0x856   :  { %v646_v4 = vmul.f32 %v1541_v63, %v643_v60  ;;  %vm652_vm12 = vweird.f32 %v1541_v63 }
 0x857   :  { %1542 = vrsqrt.f32 %v644_v1  ;;  %vm653_vm14 = vmor %vm651_vm13, %vm652_vm12  ;;  %vm661_vm5 = vweird.f32 %v644_v1 }
 0x858   :  { %v647_v5 = vmul.f32 %v1541_v63, %v646_v4 }
 0x85a   :  { %v648_v6 = vmul.f32 0.5, %v647_v5 }
 0x85c   :  { %v649_v8 = vsub.f32 1.5, %v648_v6 }
 0x85d   :  { %v1543_v9 = vpop.eup %1542 }
 0x85e   :  { %v650_v10 = vmul.f32 %v1541_v63, %v649_v8  ;;  %v656_v12 = vmul.f32 %v1543_v9, %v644_v1  ;;  %vm662_vm15 = vweird.f32 %v1543_v9 }
 0x85f   :  { %vm663_vm6 = vmor %vm661_vm5, %vm662_vm15  ;;  %vm1260_vm15 = vcmask 254976  }
 0x860   :  { %v657_v13 = vmul.f32 %v1543_v9, %v656_v12  ;;  %v654_v14 = vsel %vm653_vm14, %v1541_v63, %v650_v10 }
 0x861   :  { %v665_v18 = vmul.f32 %v654_v14, %v631_v45 }
 0x862   :  { %v658_v15 = vmul.f32 0.5, %v657_v13 }
 0x863   :  { %v668_v24 = vmul.f32 %v1488_v17, %v665_v18 }
 0x864   :  { %v659_v16 = vsub.f32 1.5, %v658_v15 }
 0x865   :  { %v1912_v25 = vadd.f32 %v1489_v22, %v668_v24 }
 0x866   :  { %v660_v2 = vmul.f32 %v1543_v9, %v659_v16 }
 0x868   :  { %v664_v21 = vsel %vm663_vm6, %v1543_v9, %v660_v2 }
 0x869   :  { %v666_v3 = vmul.f32 %v664_v21, %v632_v51 }
 0x86b   :  { %v669_v11 = vmul.f32 %v1488_v17, %v666_v3 }
 0x86d   :  { %v1914_v26 = vadd.f32 %v1489_v22, %v669_v11 }
 0x86f   :  { %v703_v27 = vpack.c.bf16 %v1914_v26, %v1912_v25 }
 0x871   :  { %1341 = vmatmul.msk.bf16.vlgmr.msra.gmra.mxu0 %vm137_vm0, %v703_v27 }
 0x8ee   :  { %v729_v28 = vpop.f32.mrf.mxu0 }
 0x8ef   :  { %v730_v31 = vadd.f32 %v1490_v29, %v729_v28 }
 0x8f6   :  { %v731_v30 = vpop.f32.mrf.mxu0 }
 0x8f7   :  { %v732_v32 = vadd.f32 %v1490_v29, %v731_v30 }
 0x8f9   :  { %v1462_v35 = vpack.i.bf16 %v732_v32, %v730_v31  ;;  %v1922_v19 = vpack.c.bf16 %v732_v32, %v730_v31 }
 0x8fb   :  { %1463 = vrot.lane.b32.xlu2 %v1462_v35, %s1724_s2  ;;  %1458 = vrot.lane.b32.xlu1 %v1462_v35, %s1726_s15 }
 0x8fc   :  { %1453 = vrot.lane.b32.xlu0 %v1462_v35, %s1725_s3 }
 0x903   :  { %762 = vrot.lane.b32.xlu2 %v1922_v19, %s1727_s16 }
 0x955   :  { %v1464_v43 = vpop.permute.xlu2 %1463 }
 0x956   :  { %v1466_v45 = vunpack.i.h.bf16 %v1464_v43  ;;  %v1465_v46 = vunpack.i.l.bf16 %v1464_v43 }
 0x958   :  { %v1932_v47 = vpack.c.bf16 %v1466_v45, %v1465_v46 }
 0x95d   :  { %v763_v48 = vpop.permute.xlu2 %762 }
 0x95e   :  { %v783_v58 = vsel %vm191_vm1, %v763_v48, 0 }
 0x96d   :  { %v1459_v36 = vpop.permute.xlu1 %1458 }
 0x96e   :  { %v1461_v37 = vunpack.i.h.bf16 %v1459_v36  ;;  %v1460_v38 = vunpack.i.l.bf16 %v1459_v36  ;;  %v1454_v40 = vpop.permute.xlu0 %1453 }
 0x96f   :  { %v1456_v23 = vunpack.i.h.bf16 %v1454_v40  ;;  %v1455_v41 = vunpack.i.l.bf16 %v1454_v40 }
 0x970   :  { %v1926_v33 = vpack.c.bf16 %v1461_v37, %v1460_v38 }
 0x971   :  { %v757_v42 = vpack.c.bf16 %v1456_v23, %v1455_v41 }
 0x972   :  { %766 = vrot.lane.b32.xlu1 %v1926_v33, %s1727_s16 }
 0x973   :  { %768 = vrot.lane.b32.xlu0 %v757_v42, %s1727_s16  ;;  %937 = vrot.lane.b32.xlu2 %v757_v42, %s1717_s26 }
 0x97b   :  { %764 = vrot.lane.b32.xlu0 %v1932_v47, %s1727_s16 }
 0x9cd   :  { %v938_v50 = vpop.permute.xlu2 %937 }
 0x9ce   :  { %959 = vmatpush.bf16.msrb.mxu0 %v938_v50 }
 0x9e4   :  { %v767_v53 = vpop.permute.xlu1 %766 }
 0x9e5   :  { %v769_v51 = vpop.permute.xlu0 %768  ;;  %v789_v55 = vsel %vm191_vm1, %v767_v53, 0 }
 0x9e6   :  { %v792_v52 = vsel %vm191_vm1, %v769_v51, 0 }
 0x9e7   :  { %798 = vmatpush.bf16.xpose.msra.mxu3 %v792_v52 }
 0x9ed   :  { %v765_v56 = vpop.permute.xlu0 %764 }
 0x9ee   :  { %v786_v57 = vsel %vm191_vm1, %v765_v56, 0 }
 0x9ef   :  { %799 = vmatpush.bf16.xpose.msra.mxu3 %v789_v55 }
 0x9f7   :  { %800 = vmatpush.bf16.xpose.msra.mxu3 %v786_v57 }
 0x9ff   :  { %801 = vmatpush.bf16.xpose.msra.mxu3 %v783_v58 }
 0xa06   :  { %1342 = vmatmul.msk.bf16.vlgmr.msra.gmra.mxu3 %vm191_vm1, %v1922_v19 }
 0xa16   :  { %1343 = vmatmul.msk.bf16.gmra.mxu3 %vm191_vm1, %v1932_v47 }
 0xa26   :  { %1344 = vmatmul.msk.bf16.gmra.mxu3 %vm191_vm1, %v1926_v33 }
 0xa36   :  { %1345 = vmatmul.msk.bf16.gmra.mxu3 %vm191_vm1, %v757_v42 }
 0xa89   :  { %v803_v60 = vpop.f32.mrf.mxu3 }
 0xa8a   :  { %v823_v61 = vmul.f32 0.35355338, %v803_v60 }
 0xa8c   :  { %v831_v62 = vadd.f32 %v823_v61, %v1814_v34 }
 0xa8e   :  { %v839_v63 = vsel %vm261_vm2, %v831_v62, -inf }
 0xa8f   :  { %840 = vmax.xlane.f32.xlu1 %v839_v63 }
 0xa91   :  { %v805_v1 = vpop.f32.mrf.mxu3 }
 0xa92   :  { %v824_v4 = vmul.f32 0.35355338, %v805_v1 }
 0xa94   :  { %v832_v5 = vadd.f32 %v824_v4, %v1818_v39 }
 0xa96   :  { %v842_v6 = vsel %vm261_vm2, %v832_v5, -inf }
 0xa97   :  { %843 = vmax.xlane.f32.xlu0 %v842_v6 }
 0xa99   :  { %v808_v8 = vpop.f32.mrf.mxu3 }
 0xa9a   :  { %v825_v9 = vmul.f32 0.35355338, %v808_v8 }
 0xa9c   :  { %v833_v10 = vadd.f32 %v825_v9, %v1822_v44 }
 0xa9e   :  { %v845_v12 = vsel %vm261_vm2, %v833_v10, -inf }
 0xa9f   :  { %846 = vmax.xlane.f32.xlu2 %v845_v12 }
 0xaa1   :  { %v810_v13 = vpop.f32.mrf.mxu3 }
 0xaa2   :  { %v826_v14 = vmul.f32 0.35355338, %v810_v13 }
 0xaa4   :  { %v1954_v34 = vadd.f32 %v826_v14, %v1829_v49 }
 0xaa6   :  { %v848_v15 = vsel %vm261_vm2, %v1954_v34, -inf }
 0xaa7   :  { %849 = vmax.xlane.f32.xlu1 %v848_v15 }
 0xaa9   :  { %v813_v39 = vpop.f32.mrf.mxu3 }
 0xaaa   :  { %v827_v16 = vmul.f32 0.35355338, %v813_v39 }
 0xaac   :  { %v835_v17 = vadd.f32 %v827_v16, %v1833_v54 }
 0xaae   :  { %v851_v18 = vsel %vm261_vm2, %v835_v17, -inf }
 0xaaf   :  { %852 = vmax.xlane.f32.xlu0 %v851_v18 }
 0xab1   :  { %v815_v44 = vpop.f32.mrf.mxu3 }
 0xab2   :  { %v828_v2 = vmul.f32 0.35355338, %v815_v44 }
 0xab4   :  { %v836_v21 = vadd.f32 %v828_v2, %v1840_v59 }
 0xab6   :  { %v854_v22 = vsel %vm261_vm2, %v836_v21, -inf }
 0xab7   :  { %855 = vmax.xlane.f32.xlu2 %v854_v22 }
 0xab9   :  { %v818_v49 = vpop.f32.mrf.mxu3 }
 0xaba   :  { %v829_v24 = vmul.f32 0.35355338, %v818_v49 }
 0xabc   :  { %v837_v3 = vadd.f32 %v829_v24, %v1844_v0 }
 0xabe   :  { %v857_v11 = vsel %vm261_vm2, %v837_v3, -inf }
 0xabf   :  { %858 = vmax.xlane.f32.xlu1 %v857_v11 }
 0xac1   :  { %v820_v27 = vpop.f32.mrf.mxu3 }
 0xac2   :  { %v830_v28 = vmul.f32 0.35355338, %v820_v27 }
 0xac4   :  { %v838_v54 = vadd.f32 %v830_v28, %v1848_v7 }
 0xac6   :  { %v860_v29 = vsel %vm261_vm2, %v838_v54, -inf }
 0xac7   :  { %861 = vmax.xlane.f32.xlu0 %v860_v29 }
 0xacf   :  { %931 = vrot.lane.b32.xlu2 %v1922_v19, %s1717_s26 }
 0xb02   :  { %v841_v59 = vpop.xlane.xlu1 %840 }
 0xb03   :  { %v863_v30 = vsub.f32 %v831_v62, %v841_v59 }
 0xb05   :  { %v871_v31 = vmul.f32 1.442695, %v863_v30 }
 0xb07   :  { %1544 = vpow2.f32 %v871_v31 }
 0xb0a   :  { %v844_v32 = vpop.xlane.xlu0 %843 }
 0xb0b   :  { %v864_v35 = vsub.f32 %v832_v5, %v844_v32 }
 0xb0d   :  { %v1968_v0 = vpop.eup %1544  ;;  %v873_v36 = vmul.f32 1.442695, %v864_v35 }
 0xb0e   :  { %v887_v37 = vsel %vm261_vm2, %v1968_v0, 0.0 }
 0xb0f   :  { %1546 = vpow2.f32 %v873_v36  ;;  %888 = vadd.xlane.f32.xlu1 %v887_v37 }
 0xb12   :  { %v847_v7 = vpop.xlane.xlu2 %846 }
 0xb13   :  { %v865_v38 = vsub.f32 %v833_v10, %v847_v7 }
 0xb15   :  { %v1547_v40 = vpop.eup %1546  ;;  %v875_v23 = vmul.f32 1.442695, %v865_v38 }
 0xb16   :  { %v890_v19 = vsel %vm261_vm2, %v1547_v40, 0.0 }
 0xb17   :  { %1548 = vpow2.f32 %v875_v23  ;;  %891 = vadd.xlane.f32.xlu0 %v890_v19 }
 0xb1a   :  { %v850_v56 = vpop.xlane.xlu1 %849 }
 0xb1b   :  { %v866_v57 = vsub.f32 %v1954_v34, %v850_v56 }
 0xb1d   :  { %v1549_v41 = vpop.eup %1548  ;;  %v877_v61 = vmul.f32 1.442695, %v866_v57 }
 0xb1e   :  { %v893_v42 = vsel %vm261_vm2, %v1549_v41, 0.0 }
 0xb1f   :  { %894 = vadd.xlane.f32.xlu2 %v893_v42 }
 0xb22   :  { %v853_v48 = vpop.xlane.xlu0 %852 }
 0xb28   :  { %935 = vrot.lane.b32.xlu1 %v1926_v33, %s1717_s26  ;;  %v867_v33 = vsub.f32 %v835_v17, %v853_v48 }
 0xb2a   :  { %v856_v43 = vpop.xlane.xlu2 %855  ;;  %v879_v58 = vmul.f32 1.442695, %v867_v33 }
 0xb2b   :  { %v868_v45 = vsub.f32 %v836_v21, %v856_v43  ;;  %933 = vrot.lane.b32.xlu0 %v1932_v47, %s1717_s26  ;;  %v1399_v43 = vld [vmem:[#allocation5 + $0x68] sm:$0xff] }
 0xb2c   :  { %1037 = vmatpush.bf16.msrb.mxu2 %v1399_v43 }
 0xb2d   :  { %v881_v46 = vmul.f32 1.442695, %v868_v45 }
 0xb2f   :  { %1550 = vpow2.f32 %v881_v46 }
 0xb32   :  { %v859_v62 = vpop.xlane.xlu1 %858  ;;  %v932_v17 = vpop.permute.xlu2 %931 }
 0xb33   :  { %v869_v63 = vsub.f32 %v837_v3, %v859_v62 }
 0xb35   :  { %v1978_v50 = vpop.eup %1550  ;;  %v883_v4 = vmul.f32 1.442695, %v869_v63 }
 0xb36   :  { %v902_v51 = vsel %vm261_vm2, %v1978_v50, 0.0 }
 0xb37   :  { %903 = vadd.xlane.f32.xlu2 %v902_v51 }
 0xb3a   :  { %v862_v52 = vpop.xlane.xlu0 %861 }
 0xb3b   :  { %v870_v53 = vsub.f32 %v838_v54, %v862_v52 }
 0xb3d   :  { %v885_v55 = vmul.f32 1.442695, %v870_v53  ;;  %v1398_v53 = vld [vmem:[#allocation5 + $0x60] sm:$0xff] }
 0xb3e   :  { %1038 = vmatpush.bf16.msrb.mxu2 %v1398_v53 }
 0xb3f   :  { %1552 = vpow2.f32 %v885_v55 }
 0xb40   :  { %1554 = vpow2.f32 %v879_v58 }
 0xb41   :  { %1556 = vpow2.f32 %v877_v61 }
 0xb42   :  { %1558 = vpow2.f32 %v883_v4 }
 0xb45   :  { %v1553_v60 = vpop.eup %1552 }
 0xb46   :  { %v908_v47 = vsel %vm261_vm2, %v1553_v60, 0.0  ;;  %v1555_v1 = vpop.eup %1554 }
 0xb47   :  { %909 = vadd.xlane.f32.xlu2 %v908_v47  ;;  %v1557_v5 = vpop.eup %1556  ;;  %v899_v6 = vsel %vm261_vm2, %v1555_v1, 0.0 }
 0xb48   :  { %v896_v8 = vsel %vm261_vm2, %v1557_v5, 0.0  ;;  %v1559_v9 = vpop.eup %1558 }
 0xb49   :  { %v905_v10 = vsel %vm261_vm2, %v1559_v9, 0.0 }
 0xb52   :  { %900 = vadd.xlane.f32.xlu1 %v899_v6 }
 0xb55   :  { %897 = vadd.xlane.f32.xlu0 %v896_v8 }
 0xb5d   :  { %906 = vadd.xlane.f32.xlu0 %v905_v10  ;;  %v1491_v10 = vld [vmem:[#allocation7 + $0x9] ss:$0 sm:$0xff] }
 0xb82   :  { %v889_v12 = vpop.xlane.xlu1 %888 }
 0xb8a   :  { %v892_v13 = vpop.xlane.xlu0 %891 }
 0xb8b   :  { %1560 = vrcp.f32 %v892_v13 }
 0xb8c   :  { %1562 = vrcp.f32 %v889_v12 }
 0xb91   :  { %v1561_v34 = vpop.eup %1560 }
 0xb92   :  { %v1563_v39 = vpop.eup %1562  ;;  %v920_v16 = vmul.f32 %v1561_v34, %v1547_v40  ;;  %v895_v2 = vpop.xlane.xlu2 %894 }
 0xb93   :  { %v919_v18 = vmul.f32 %v1563_v39, %v1968_v0  ;;  %1564 = vrcp.f32 %v895_v2 }
 0xb95   :  { %v927_v44 = vpack.c.bf16 %v920_v16, %v919_v18  ;;  %v1401_v18 = vld [vmem:[#allocation5 + $0x78] sm:$0xff] }
 0xb96   :  { %1120 = vmatpush.bf16.msrb.mxu1 %v1401_v18 }
 0xb99   :  { %v1565_v22 = vpop.eup %1564 }
 0xb9a   :  { %v936_v14 = vpop.permute.xlu1 %935  ;;  %v921_v24 = vmul.f32 %v1565_v22, %v1549_v41 }
 0xb9b   :  { %960 = vmatpush.bf16.msrb.mxu0 %v936_v14 }
 0xb9d   :  { %v934_v15 = vpop.permute.xlu0 %933 }
 0xb9f   :  { %961 = vmatpush.bf16.msrb.mxu0 %v934_v15 }
 0xba3   :  { %962 = vmatpush.bf16.msrb.mxu0 %v932_v17 }
 0xba6   :  { %1346 = vmatmul.msk.bf16.vlgmr.msrb.gmra.mxu0 %vm261_vm2, %v927_v44 }
 0xbaa   :  { %v904_v28 = vpop.xlane.xlu2 %903 }
 0xbba   :  { %v910_v35 = vpop.xlane.xlu2 %909 }
 0xbc5   :  { %v901_v11 = vpop.xlane.xlu1 %900 }
 0xbc8   :  { %v898_v21 = vpop.xlane.xlu0 %897 }
 0xbc9   :  { %1566 = vrcp.f32 %v898_v21 }
 0xbca   :  { %1568 = vrcp.f32 %v901_v11 }
 0xbcb   :  { %1570 = vrcp.f32 %v904_v28 }
 0xbcf   :  { %v1567_v49 = vpop.eup %1566 }
 0xbd0   :  { %v922_v3 = vmul.f32 %v1567_v49, %v1557_v5  ;;  %v1569_v54 = vpop.eup %1568  ;;  %v907_v31 = vpop.xlane.xlu0 %906 }
 0xbd1   :  { %v1571_v29 = vpop.eup %1570  ;;  %v923_v59 = vmul.f32 %v1569_v54, %v1555_v1  ;;  %1572 = vrcp.f32 %v907_v31 }
 0xbd2   :  { %v928_v27 = vpack.c.bf16 %v922_v3, %v921_v24  ;;  %v924_v30 = vmul.f32 %v1571_v29, %v1978_v50  ;;  %1574 = vrcp.f32 %v910_v35 }
 0xbd4   :  { %1347 = vmatmul.msk.bf16.gmra.mxu0 %vm261_vm2, %v928_v27  ;;  %v929_v32 = vpack.c.bf16 %v924_v30, %v923_v59  ;;  %v1400_v27 = vld [vmem:[#allocation5 + $0x70] sm:$0xff] }
 0xbd5   :  { %1121 = vmatpush.bf16.msrb.mxu1 %v1400_v27 }
 0xbd7   :  { %v1573_v0 = vpop.eup %1572 }
 0xbd8   :  { %v1575_v36 = vpop.eup %1574  ;;  %v925_v37 = vmul.f32 %v1573_v0, %v1559_v9 }
 0xbd9   :  { %v926_v7 = vmul.f32 %v1575_v36, %v1553_v60 }
 0xbdb   :  { %v930_v38 = vpack.c.bf16 %v926_v7, %v925_v37 }
 0xbe4   :  { %1348 = vmatmul.msk.bf16.gmra.mxu0 %vm261_vm2, %v929_v32 }
 0xbf4   :  { %1349 = vmatmul.msk.bf16.gmra.mxu0 %vm261_vm2, %v930_v38 }
 0xc23   :  { %v964_v40 = vpop.f32.mrf.mxu0 }
 0xc2b   :  { %v966_v23 = vpop.f32.mrf.mxu0 }
 0xc51   :  { %v969_v19 = vpop.f32.mrf.mxu0 }
 0xc59   :  { %v971_v41 = vpop.f32.mrf.mxu0 }
 0xc5a   :  { %v1467_v42 = vpack.i.bf16 %v971_v41, %v969_v19 }
 0xc5c   :  { %1468 = vrot.lane.b32.xlu1 %v1467_v42, %s1721_s1 }
 0xc61   :  { %v974_v45 = vpop.f32.mrf.mxu0 }
 0xc69   :  { %v976_v46 = vpop.f32.mrf.mxu0 }
 0xc6a   :  { %v1472_v48 = vpack.i.bf16 %v976_v46, %v974_v45  ;;  %v1492_v45 = vld [vmem:[#allocation7 + $0xc] ss:$0 sm:$0xff] }
 0xc6c   :  { %1473 = vrot.lane.b32.xlu0 %v1472_v48, %s1728_s17 }
 0xc71   :  { %v979_v50 = vpop.f32.mrf.mxu0 }
 0xc79   :  { %v981_v51 = vpop.f32.mrf.mxu0 }
 0xc7a   :  { %v1477_v52 = vpack.i.bf16 %v981_v51, %v979_v50 }
 0xc7c   :  { %1478 = vrot.lane.b32.xlu2 %v1477_v52, %s1729_s18  ;;  %v1493_v52 = vld [vmem:[#allocation7 + $0xd] ss:$0 sm:$0xff] }
 0xcce   :  { %v1469_v55 = vpop.permute.xlu1 %1468 }
 0xccf   :  { %v1471_v56 = vunpack.i.h.bf16 %v1469_v55  ;;  %v1470_v33 = vunpack.i.l.bf16 %v1469_v55 }
 0xcd1   :  { %v1009_v61 = vsel %vm191_vm1, %v966_v23, %v1471_v56  ;;  %v1008_v62 = vsel %vm191_vm1, %v964_v40, %v1470_v33 }
 0xcd6   :  { %v1479_v57 = vpop.permute.xlu2 %1478 }
 0xcd7   :  { %v1481_v63 = vunpack.i.h.bf16 %v1479_v57  ;;  %v1480_v1 = vunpack.i.l.bf16 %v1479_v57  ;;  %v1405_v57 = vld [vmem:[#allocation5 + $0x98] sm:$0xff] }
 0xcd8   :  { %1179 = vmatpush.bf16.msra.mxu2 %v1405_v57 }
 0xcde   :  { %v1474_v58 = vpop.permute.xlu0 %1473 }
 0xcdf   :  { %v1476_v60 = vunpack.i.h.bf16 %v1474_v58  ;;  %v1475_v47 = vunpack.i.l.bf16 %v1474_v58  ;;  %v1404_v58 = vld [vmem:[#allocation5 + $0x90] sm:$0xff] }
 0xce0   :  { %1180 = vmatpush.bf16.msra.mxu2 %v1404_v58 }
 0xce1   :  { %v1011_v4 = vsel %vm433_vm3, %v1009_v61, %v1476_v60  ;;  %v1010_v5 = vsel %vm433_vm3, %v1008_v62, %v1475_v47  ;;  %v1403_v60 = vld [vmem:[#allocation5 + $0x88] sm:$0xff]  ;;  %v1402_v47 = vld [vmem:[#allocation5 + $0x80] sm:$0xff] }
 0xce2   :  { %v1012_v6 = vsel %vm436_vm4, %v1010_v5, %v1480_v1  ;;  %v1013_v8 = vsel %vm436_vm4, %v1011_v4, %v1481_v63  ;;  %v1494_v61 = vld [vmem:[#allocation7 + $0xa] ss:$0 sm:$0xff] }
 0xce3   :  { %v1014_v9 = vpack.c.bf16 %v1013_v8, %v1012_v6 }
 0xce4   :  { %1181 = vmatpush.bf16.msra.mxu2 %v1403_v60 }
 0xce5   :  { %1358 = vmatmul.msk.bf16.vlgmr.msrb.gmra.mxu2 %vm137_vm0, %v1014_v9 }
 0xce8   :  { %1182 = vmatpush.bf16.msra.mxu2 %v1402_v47 }
 0xd68   :  { %v1040_v12 = vpop.f32.mrf.mxu2 }
 0xd69   :  { %v1041_v13 = vadd.f32 %v1491_v10, %v1040_v12 }
 0xd6b   :  { %v1045_v14 = vadd.f32 %v1041_v13, %v1912_v25 }
 0xd6d   :  { %v1047_v34 = vsel %vm137_vm0, %v1045_v14, 0.0 }
 0xd6e   :  { %1048 = vadd.xlane.f32.xlu0 %v1047_v34 }
 0xd70   :  { %v1042_v15 = vpop.f32.mrf.mxu2 }
 0xd71   :  { %v1043_v39 = vadd.f32 %v1491_v10, %v1042_v15 }
 0xd73   :  { %v1046_v16 = vadd.f32 %v1043_v39, %v1914_v26 }
 0xd75   :  { %v1050_v17 = vsel %vm137_vm0, %v1046_v16, 0.0 }
 0xd76   :  { %1051 = vadd.xlane.f32.xlu1 %v1050_v17 }
 0xde1   :  { %v1049_v44 = vpop.xlane.xlu0 %1048 }
 0xde2   :  { %v1053_v2 = vmul.f32 %v1049_v44, %v1894_v20 }
 0xde4   :  { %v1055_v21 = vsub.f32 %v1045_v14, %v1053_v2 }
 0xde6   :  { %v1057_v22 = vmul.f32 %v1055_v21, %v1055_v21 }
 0xde8   :  { %v1059_v49 = vsel %vm137_vm0, %v1057_v22, 0.0 }
 0xde9   :  { %v1052_v25 = vpop.xlane.xlu1 %1051  ;;  %1060 = vadd.xlane.f32.xlu2 %v1059_v49 }
 0xdea   :  { %v1054_v24 = vmul.f32 %v1052_v25, %v1894_v20  ;;  %v1495_v25 = vld [vmem:[#allocation7 + $0xb] ss:$0 sm:$0xff] }
 0xdec   :  { %v1056_v3 = vsub.f32 %v1046_v16, %v1054_v24 }
 0xdee   :  { %v1058_v11 = vmul.f32 %v1056_v3, %v1056_v3 }
 0xdf0   :  { %v1062_v26 = vsel %vm137_vm0, %v1058_v11, 0.0 }
 0xdf1   :  { %1063 = vadd.xlane.f32.xlu0 %v1062_v26 }
 0xe5c   :  { %v1061_v28 = vpop.xlane.xlu2 %1060 }
 0xe5d   :  { %v1065_v54 = vmul.f32 %v1061_v28, %v1894_v20 }
 0xe5f   :  { %v1067_v29 = vadd.f32 1e-12, %v1065_v54 }
 0xe61   :  { %1576 = vrsqrt.f32 %v1067_v29  ;;  %vm1075_vm4 = vweird.f32 %v1067_v29 }
 0xe64   :  { %v1064_v59 = vpop.xlane.xlu0 %1063 }
 0xe65   :  { %v1066_v30 = vmul.f32 %v1064_v59, %v1894_v20 }
 0xe67   :  { %v1577_v31 = vpop.eup %1576  ;;  %v1068_v32 = vadd.f32 1e-12, %v1066_v30 }
 0xe68   :  { %v1070_v35 = vmul.f32 %v1577_v31, %v1067_v29  ;;  %vm1076_vm1 = vweird.f32 %v1577_v31 }
 0xe69   :  { %1578 = vrsqrt.f32 %v1068_v32  ;;  %vm1077_vm7 = vmor %vm1075_vm4, %vm1076_vm1  ;;  %vm1085_vm9 = vweird.f32 %v1068_v32 }
 0xe6a   :  { %v1071_v0 = vmul.f32 %v1577_v31, %v1070_v35 }
 0xe6c   :  { %v1072_v36 = vmul.f32 0.5, %v1071_v0 }
 0xe6e   :  { %v1073_v37 = vsub.f32 1.5, %v1072_v36 }
 0xe6f   :  { %v1579_v7 = vpop.eup %1578 }
 0xe70   :  { %v1074_v38 = vmul.f32 %v1577_v31, %v1073_v37  ;;  %v1080_v40 = vmul.f32 %v1579_v7, %v1068_v32  ;;  %vm1086_vm8 = vweird.f32 %v1579_v7 }
 0xe71   :  { %vm1087_vm10 = vmor %vm1085_vm9, %vm1086_vm8 }
 0xe72   :  { %v1081_v23 = vmul.f32 %v1579_v7, %v1080_v40  ;;  %v1078_v19 = vsel %vm1077_vm7, %v1577_v31, %v1074_v38 }
 0xe73   :  { %v1089_v43 = vmul.f32 %v1078_v19, %v1055_v21 }
 0xe74   :  { %v1082_v41 = vmul.f32 0.5, %v1081_v23 }
 0xe75   :  { %v1092_v51 = vmul.f32 %v1492_v45, %v1089_v43 }
 0xe76   :  { %v1083_v42 = vsub.f32 1.5, %v1082_v41 }
 0xe77   :  { %v1095_v55 = vadd.f32 %v1493_v52, %v1092_v51 }
 0xe78   :  { %v1084_v46 = vmul.f32 %v1579_v7, %v1083_v42 }
 0xe7a   :  { %v1088_v48 = vsel %vm1087_vm10, %v1579_v7, %v1084_v46 }
 0xe7b   :  { %v1090_v50 = vmul.f32 %v1088_v48, %v1056_v3 }
 0xe7d   :  { %v1093_v53 = vmul.f32 %v1492_v45, %v1090_v50 }
 0xe7f   :  { %v1096_v56 = vadd.f32 %v1493_v52, %v1093_v53 }
 0xe81   :  { %v1097_v33 = vpack.c.bf16 %v1096_v56, %v1095_v55 }
 0xe83   :  { %1367 = vmatmul.msk.bf16.vlgmr.msrb.gmra.mxu1 %vm137_vm0, %v1097_v33 }
 0xf00   :  { %v1123_v62 = vpop.f32.mrf.mxu1 }
 0xf01   :  { %v1124_v63 = vadd.f32 %v1494_v61, %v1123_v62 }
 0xf03   :  { %v1130_v1 = vmul.f32 0.044715, %v1124_v63  ;;  %v1128_v18 = vmul.f32 0.5, %v1124_v63 }
 0xf05   :  { %v1132_v4 = vmul.f32 %v1130_v1, %v1124_v63  ;;  %v1497_v1 = vld [vmem:[#allocation7 + $0xf] ss:$0 sm:$0xff] }
 0xf07   :  { %v1134_v5 = vmul.f32 %v1132_v4, %v1124_v63 }
 0xf08   :  { %v1125_v6 = vpop.f32.mrf.mxu1 }
 0xf09   :  { %v1136_v8 = vadd.f32 %v1134_v5, %v1124_v63  ;;  %v1126_v9 = vadd.f32 %v1494_v61, %v1125_v6 }
 0xf0b   :  { %v1131_v10 = vmul.f32 0.044715, %v1126_v9  ;;  %v1138_v12 = vmul.f32 0.7978846, %v1136_v8  ;;  %v1129_v44 = vmul.f32 0.5, %v1126_v9 }
 0xf0c   :  { %v1241_v8 = vld [vmem:[%s2034_s4] sm:$0x3] }
 0xf0d   :  { %v1133_v13 = vmul.f32 %v1131_v10, %v1126_v9  ;;  %1580 = vtanh.f32 %v1138_v12  ;;  %v1242_v10 = vpack.c.bf16 %v1241_v8, %v1241_v8 }
 0xf0f   :  { %v1135_v14 = vmul.f32 %v1133_v13, %v1126_v9 }
 0xf11   :  { %v1137_v34 = vadd.f32 %v1135_v14, %v1126_v9 }
 0xf13   :  { %v1139_v15 = vmul.f32 0.7978846, %v1137_v34  ;;  %v1581_v39 = vpop.eup %1580 }
 0xf14   :  { %v1142_v16 = vadd.f32 1.0, %v1581_v39 }
 0xf15   :  { %1582 = vtanh.f32 %v1139_v15 }
 0xf16   :  { %v1144_v21 = vmul.f32 %v1142_v16, %v1128_v18 }
 0xf1b   :  { %v1583_v17 = vpop.eup %1582 }
 0xf1c   :  { %v1143_v2 = vadd.f32 1.0, %v1583_v17 }
 0xf1e   :  { %v1145_v22 = vmul.f32 %v1143_v2, %v1129_v44 }
 0xf20   :  { %v1146_v49 = vpack.c.bf16 %v1145_v22, %v1144_v21 }
 0xf22   :  { %1384 = vmatmul.msk.bf16.vlgmr.msra.gmra.mxu2 %vm261_vm2, %v1146_v49 }
 0xfa5   :  { %v1184_v24 = vpop.f32.mrf.mxu2 }
 0xfa6   :  { %v1185_v3 = vadd.f32 %v1495_v25, %v1184_v24 }
 0xfa8   :  { %v1189_v11 = vadd.f32 %v1185_v3, %v1095_v55 }
 0xfaa   :  { %v1191_v26 = vsel %vm137_vm0, %v1189_v11, 0.0 }
 0xfab   :  { %1192 = vadd.xlane.f32.xlu1 %v1191_v26 }
 0xfad   :  { %v1186_v27 = vpop.f32.mrf.mxu2 }
 0xfae   :  { %v1187_v28 = vadd.f32 %v1495_v25, %v1186_v27 }
 0xfb0   :  { %v1190_v54 = vadd.f32 %v1187_v28, %v1096_v56 }
 0xfb2   :  { %v1194_v29 = vsel %vm137_vm0, %v1190_v54, 0.0 }
 0xfb3   :  { %1195 = vadd.xlane.f32.xlu2 %v1194_v29 }
0x101e   :  { %v1193_v59 = vpop.xlane.xlu1 %1192 }
0x101f   :  { %v1197_v30 = vmul.f32 %v1193_v59, %v1894_v20 }
0x1021   :  { %v1199_v31 = vsub.f32 %v1189_v11, %v1197_v30 }
0x1023   :  { %v1201_v32 = vmul.f32 %v1199_v31, %v1199_v31 }
0x1025   :  { %v1203_v35 = vsel %vm137_vm0, %v1201_v32, 0.0 }
0x1026   :  { %v1196_v0 = vpop.xlane.xlu2 %1195  ;;  %1204 = vadd.xlane.f32.xlu0 %v1203_v35 }
0x1027   :  { %v1198_v36 = vmul.f32 %v1196_v0, %v1894_v20 }
0x1029   :  { %v1200_v37 = vsub.f32 %v1190_v54, %v1198_v36 }
0x102b   :  { %v1202_v7 = vmul.f32 %v1200_v37, %v1200_v37 }
0x102d   :  { %v1206_v38 = vsel %vm137_vm0, %v1202_v7, 0.0 }
0x102e   :  { %1207 = vadd.xlane.f32.xlu1 %v1206_v38 }
0x1099   :  { %v1205_v40 = vpop.xlane.xlu0 %1204 }
0x109a   :  { %v1209_v23 = vmul.f32 %v1205_v40, %v1894_v20 }
0x109c   :  { %v1211_v19 = vadd.f32 1e-12, %v1209_v23 }
0x109e   :  { %1584 = vrsqrt.f32 %v1211_v19  ;;  %vm1219_vm0 = vweird.f32 %v1211_v19 }
0x10a1   :  { %v1208_v41 = vpop.xlane.xlu1 %1207 }
0x10a2   :  { %v1210_v42 = vmul.f32 %v1208_v41, %v1894_v20  ;;  %v1496_v20 = vld [vmem:[#allocation7 + $0xe] ss:$0 sm:$0xff] }
0x10a4   :  { %v1585_v43 = vpop.eup %1584  ;;  %v1212_v45 = vadd.f32 1e-12, %v1210_v42 }
0x10a5   :  { %v1214_v46 = vmul.f32 %v1585_v43, %v1211_v19  ;;  %vm1220_vm2 = vweird.f32 %v1585_v43 }
0x10a6   :  { %1586 = vrsqrt.f32 %v1212_v45  ;;  %vm1221_vm11 = vmor %vm1219_vm0, %vm1220_vm2  ;;  %vm1229_vm13 = vweird.f32 %v1212_v45 }
0x10a7   :  { %v1215_v48 = vmul.f32 %v1585_v43, %v1214_v46 }
0x10a9   :  { %v1216_v50 = vmul.f32 0.5, %v1215_v48 }
0x10ab   :  { %v1217_v51 = vsub.f32 1.5, %v1216_v50 }
0x10ac   :  { %v1587_v52 = vpop.eup %1586 }
0x10ad   :  { %v1218_v53 = vmul.f32 %v1585_v43, %v1217_v51  ;;  %v1224_v55 = vmul.f32 %v1587_v52, %v1212_v45  ;;  %vm1230_vm12 = vweird.f32 %v1587_v52 }
0x10ae   :  { %vm1231_vm14 = vmor %vm1229_vm13, %vm1230_vm12 }
0x10af   :  { %v1225_v56 = vmul.f32 %v1587_v52, %v1224_v55  ;;  %v1222_v33 = vsel %vm1221_vm11, %v1585_v43, %v1218_v53 }
0x10b0   :  { %v1233_v60 = vmul.f32 %v1222_v33, %v1199_v31 }
0x10b1   :  { %v1226_v57 = vmul.f32 0.5, %v1225_v56 }
0x10b2   :  { %v1236_v63 = vmul.f32 %v1496_v20, %v1233_v60 }
0x10b3   :  { %v1227_v58 = vsub.f32 1.5, %v1226_v57 }
0x10b4   :  { %v1239_v5 = vadd.f32 %v1497_v1, %v1236_v63 }
0x10b5   :  { %v1228_v47 = vmul.f32 %v1587_v52, %v1227_v58 }
0x10b7   :  { %v1232_v61 = vsel %vm1231_vm14, %v1587_v52, %v1228_v47 }
0x10b8   :  { %v1234_v62 = vmul.f32 %v1232_v61, %v1200_v37 }
0x10ba   :  { %v1237_v4 = vmul.f32 %v1496_v20, %v1234_v62 }
0x10bc   :  { %v1240_v6 = vadd.f32 %v1497_v1, %v1237_v4 }
0x10be   :  { %v1243_v9 = vpack.c.bf16 %v1240_v6, %v1239_v5 }
0x10c0   :  { %1254 = vmatpush.bf16.msra.mxu1 %v1243_v9 }
0x10c3   :  { %1385 = vmatmul.msk.bf16.vlgmr.msra.gmra.mxu1 %vm433_vm3, %v1242_v10 }
0x1140   :  { %v1256_v12 = vpop.f32.mrf.mxu1 }
0x1141   :  { %1261 = vst.msk [vmem:[#allocation10] sm:$0x3] %vm1260_vm15, %v1256_v12 }
0x1142   :  { %1272 = dma.vmem_to_hbm [thread:$0]  %s1268_s22, 32, %s1270_s25, [#allocation4]  }
0x1148   :  { %v1258_v13 = vpop.f32.mrf.mxu1 }
0x1149   :  { %1714 = dma.done.wait [#allocation4], 32  }
0x114a   :  { %1715 = vsyncadd [#allocation4], 4294967264 }
0x114b   :  { %1277 = vsyncpa [#allocation3], 1 }
0x114c   :  { %1278 = vsyncpa [#allocation6], 1 }
0x114d   :  { %1279 = vsyncpa [#allocation9], 1 }
0x114e   :  { %1280 = vsyncpa [#allocation4], 1 }

</bundles_post_ra>
